<compile_context>
chip_gen: v7x
topology: tpu7x:2x2x1
jax: 0.10.0
libtpu: 0.0.40
codegen_flags: <defaults>
</compile_context>

<pallas_src>
import numpy as np
import jax
import jax.numpy as jnp
from jax.experimental import pallas as pl
from jax.experimental.pallas import tpu as pltpu

# ---- small t5-small-like config (synthetic, scaled down) --------------------
VOCAB = 64
D_MODEL = 32          # t5-small would be 512; scaled down per instructions
D_FF = 64
N_HEADS = 4
D_HEAD = 8
D_INNER = N_HEADS * D_HEAD      # 32
N_LAYERS = 2
SEQ = 8
BATCH = 2
EPS = 1e-6
REL_BUCKETS = 32
REL_MAX_DIST = 128

# lane-dense padded sizes (TPU vreg lane width = 128)
D_PAD = 128           # padded model dim
F_PAD = 128           # padded FFN dim
TOKENS = BATCH * SEQ  # batch folded into rows
NEG_INF = -1e9


# =============================== Pallas kernel ===============================

def fused_rankt5_kernel(x_ref, bias_ref, ln1_ref, wqk_ref, wvo_ref,
                        ln2_ref, wi_ref, wo_ff_ref, lnf_ref, dw_ref, db_ref,
                        o_ref):
    """Entire RankT5Enc forward on B*S tokens resident in VMEM (no grid).

    x_ref:     (T, D_PAD)   f32   embedded tokens (padded cols exactly zero)
    bias_ref:  (H, T, T)    f32   rel-pos bias + block-diagonal batch mask
    ln1/ln2:   (L, D_PAD)   f32   RMSNorm weights per layer
    wqk:       (L, H, D_PAD, D_PAD) bf16   per-head fused Wq @ Wk^T
    wvo:       (L, H, D_PAD, D_PAD) bf16   per-head fused Wv @ Wo
    wi:        (L, D_PAD, F_PAD)    bf16   FFN up
    wo_ff:     (L, F_PAD, D_PAD)    bf16   FFN down
    lnf:       (1, D_PAD)   f32   final RMSNorm weight
    dw:        (1, D_PAD)   f32   dense-head column (only first D_MODEL real)
    db:        (1, 1)       f32   dense-head bias
    o_ref:     (B, 1)       f32   scores
    """
    inv_d = jnp.float32(1.0 / D_MODEL)

    def rms(v, w):
        # T5 "LayerNorm" = RMSNorm; reduce over the REAL model dim only
        # (padded columns of v are exactly zero, so the sum is unaffected).
        var = jnp.sum(v * v, axis=-1, keepdims=True) * inv_d
        return v * jax.lax.rsqrt(var + EPS) * w

    x = x_ref[...]          # (T, D_PAD) f32 residual stream
    bias = bias_ref[...]    # (H, T, T)  f32

    for l in range(N_LAYERS):                     # static, unrolled
        # --------- self-attention via per-head fused (WqWk^T) / (WvWo) -------
        xn = rms(x, ln1_ref[l])                   # (T, D_PAD) f32
        xn_b = xn.astype(jnp.bfloat16)            # bf16 MXU operand (once)
        attn = jnp.zeros((TOKENS, D_PAD), jnp.float32)
        for h in range(N_HEADS):                  # static, unrolled
            # scores = (xn Wq_h)(xn Wk_h)^T = (xn @ (Wq_h Wk_h^T)) @ xn^T
            qa = jnp.dot(xn_b, wqk_ref[l, h],
                         preferred_element_type=jnp.float32)      # (T, D_PAD)
            scores = jnp.dot(qa, xn.T,
                             preferred_element_type=jnp.float32) + bias[h]
            # T5 does NOT scale by 1/sqrt(d_head).
            scores = scores - jnp.max(scores, axis=-1, keepdims=True)
            p = jnp.exp(scores)                                   # (T, T)
            p = p * pl.reciprocal(jnp.sum(p, axis=-1, keepdims=True),
                                  approx=True)
            # ctx_h @ Wo_h = p @ (xn @ (Wv_h Wo_h))  -- already 128-lane dense
            vb = jnp.dot(xn_b, wvo_ref[l, h],
                         preferred_element_type=jnp.float32)      # (T, D_PAD)
            attn = attn + jnp.dot(p, vb, preferred_element_type=jnp.float32)
        x = x + attn

        # --------- FFN: RMSNorm -> Linear -> ReLU -> Linear ------------------
        xn = rms(x, ln2_ref[l])
        h_ff = jnp.maximum(
            jnp.dot(xn.astype(jnp.bfloat16), wi_ref[l],
                    preferred_element_type=jnp.float32), 0.0)     # (T, F_PAD)
        x = x + jnp.dot(h_ff.astype(jnp.bfloat16), wo_ff_ref[l],
                        preferred_element_type=jnp.float32)

    # --------- final RMSNorm -> mean pool -> dense head (VPU reduction) ------
    hn = rms(x, lnf_ref[0])                                       # (T, D_PAD)
    pooled = jnp.mean(hn.reshape(BATCH, SEQ, D_PAD), axis=1)      # (B, D_PAD)
    score = jnp.sum(pooled * dw_ref[...], axis=-1, keepdims=True) + db_ref[...]
    o_ref[...] = score.astype(o_ref.dtype)


# =============================== wrapper =====================================

def rankt5_fused_call(x_flat, kp):
    args = (
        x_flat,             # (T, D_PAD)               f32
        kp["bias"],         # (H, T, T)                f32
        kp["ln1"],          # (L, D_PAD)               f32
        kp["wqk"],          # (L, H, D_PAD, D_PAD)     bf16
        kp["wvo"],          # (L, H, D_PAD, D_PAD)     bf16
        kp["ln2"],          # (L, D_PAD)               f32
        kp["wi"],           # (L, D_PAD, F_PAD)        bf16
        kp["wo_ff"],        # (L, F_PAD, D_PAD)        bf16
        kp["ln_f"],         # (1, D_PAD)               f32
        kp["dw"],           # (1, D_PAD)               f32
        kp["db"],           # (1, 1)                   f32
    )
    # Gridless call: every operand lands whole in VMEM, no pipeline machinery,
    # no double buffering of single-use weights.
    in_specs = [pl.BlockSpec(memory_space=pltpu.MemorySpace.VMEM)
                for _ in args]
    return pl.pallas_call(
        fused_rankt5_kernel,
        out_shape=jax.ShapeDtypeStruct((BATCH, 1), jnp.float32),
        in_specs=in_specs,
        out_specs=pl.BlockSpec(memory_space=pltpu.MemorySpace.VMEM),
    )(*args)


# ============================ JAX glue (non-hot-path) ========================

def relative_position_bucket(rel_pos, num_buckets=REL_BUCKETS,
                             max_distance=REL_MAX_DIST):
    """Bidirectional T5 relative-position bucketization (integer math glue)."""
    num_buckets //= 2
    buckets = (rel_pos > 0).astype(jnp.int32) * num_buckets
    rel_pos = jnp.abs(rel_pos)
    max_exact = num_buckets // 2
    is_small = rel_pos < max_exact
    rel_large = max_exact + (
        jnp.log(jnp.maximum(rel_pos, 1).astype(jnp.float32) / max_exact)
        / np.log(max_distance / max_exact)
        * (num_buckets - max_exact)
    ).astype(jnp.int32)
    rel_large = jnp.minimum(rel_large, num_buckets - 1)
    return buckets + jnp.where(is_small, rel_pos, rel_large)


def compute_position_bias(rel_bias_emb, seq_len):
    q_pos = jnp.arange(seq_len)[:, None]
    k_pos = jnp.arange(seq_len)[None, :]
    buckets = relative_position_bucket(k_pos - q_pos)          # (S, S)
    bias = rel_bias_emb[buckets]                               # (S, S, H)
    return jnp.transpose(bias, (2, 0, 1)).astype(jnp.float32)  # (H, S, S)


def build_bias_mask(rel_bias_emb, batch, seq_len):
    """(H, B*S, B*S) rel-pos bias tiled block-diagonally over batch; cross-
    batch positions get a large negative so softmax zeroes them."""
    bias = compute_position_bias(rel_bias_emb, seq_len)        # (H, S, S)
    t = batch * seq_len
    tok_batch = jnp.arange(t) // seq_len
    same = tok_batch[:, None] == tok_batch[None, :]            # (T, T)
    bias_tiled = jnp.tile(bias, (1, batch, batch))             # (H, T, T)
    return jnp.where(same[None], bias_tiled, NEG_INF).astype(jnp.float32)


def _bf16_roundtrip(a):
    return a.astype(jnp.bfloat16).astype(jnp.float32)


def init_master_params(key):
    """Synthetic deterministic master weights in the standard T5 layout.
    Matmul weights are bf16-representable so kernel/reference share values."""
    keys = jax.random.split(key, 4 + N_LAYERS)
    scale = 0.05

    emb = scale * jax.random.normal(keys[0], (VOCAB, D_MODEL), jnp.float32)
    rel_bias = scale * jax.random.normal(keys[1], (REL_BUCKETS, N_HEADS),
                                         jnp.float32)
    dense_w = scale * jax.random.normal(keys[2], (D_MODEL, 1), jnp.float32)

    wq = []; wk = []; wv = []; wo = []; wi = []; wo_ff = []
    for l in range(N_LAYERS):
        lk = jax.random.split(keys[4 + l], 6)
        wq.append(_bf16_roundtrip(
            scale * jax.random.normal(lk[0], (D_MODEL, D_INNER), jnp.float32)))
        wk.append(_bf16_roundtrip(
            scale * jax.random.normal(lk[1], (D_MODEL, D_INNER), jnp.float32)))
        wv.append(_bf16_roundtrip(
            scale * jax.random.normal(lk[2], (D_MODEL, D_INNER), jnp.float32)))
        wo.append(_bf16_roundtrip(
            scale * jax.random.normal(lk[3], (D_INNER, D_MODEL), jnp.float32)))
        wi.append(_bf16_roundtrip(
            scale * jax.random.normal(lk[4], (D_MODEL, D_FF), jnp.float32)))
        wo_ff.append(_bf16_roundtrip(
            scale * jax.random.normal(lk[5], (D_FF, D_MODEL), jnp.float32)))

    return {
        "emb": emb, "rel_bias": rel_bias,
        "wq": jnp.stack(wq), "wk": jnp.stack(wk), "wv": jnp.stack(wv),
        "wo": jnp.stack(wo), "wi": jnp.stack(wi), "wo_ff": jnp.stack(wo_ff),
        "ln1": jnp.ones((N_LAYERS, D_MODEL), jnp.float32),
        "ln2": jnp.ones((N_LAYERS, D_MODEL), jnp.float32),
        "ln_f": jnp.ones((D_MODEL,), jnp.float32),
        "dense_w": dense_w,
        "dense_b": jnp.zeros((1,), jnp.float32),
    }


def build_kernel_params(mp):
    """One-time fusion / zero-padding / bf16 cast of the kernel operands.
    Also precomputes the (H, T, T) bias+batch-mask (hoisted out of forward)."""
    wqk = jnp.zeros((N_LAYERS, N_HEADS, D_PAD, D_PAD), jnp.float32)
    wvo = jnp.zeros((N_LAYERS, N_HEADS, D_PAD, D_PAD), jnp.float32)
    for l in range(N_LAYERS):
        for h in range(N_HEADS):
            sl = slice(h * D_HEAD, (h + 1) * D_HEAD)
            a = mp["wq"][l][:, sl] @ mp["wk"][l][:, sl].T   # (D_MODEL, D_MODEL)
            b = mp["wv"][l][:, sl] @ mp["wo"][l][sl, :]     # (D_MODEL, D_MODEL)
            wqk = wqk.at[l, h, :D_MODEL, :D_MODEL].set(a)
            wvo = wvo.at[l, h, :D_MODEL, :D_MODEL].set(b)

    wi = jnp.zeros((N_LAYERS, D_PAD, F_PAD), jnp.float32)
    wi = wi.at[:, :D_MODEL, :D_FF].set(mp["wi"])
    wo_ff = jnp.zeros((N_LAYERS, F_PAD, D_PAD), jnp.float32)
    wo_ff = wo_ff.at[:, :D_FF, :D_MODEL].set(mp["wo_ff"])

    ln1 = jnp.zeros((N_LAYERS, D_PAD), jnp.float32).at[:, :D_MODEL].set(mp["ln1"])
    ln2 = jnp.zeros((N_LAYERS, D_PAD), jnp.float32).at[:, :D_MODEL].set(mp["ln2"])
    ln_f = jnp.zeros((1, D_PAD), jnp.float32).at[0, :D_MODEL].set(mp["ln_f"])

    dw = jnp.zeros((1, D_PAD), jnp.float32).at[0, :D_MODEL].set(mp["dense_w"][:, 0])
    db = mp["dense_b"].reshape(1, 1)

    emb_pad = jnp.zeros((VOCAB, D_PAD), jnp.float32).at[:, :D_MODEL].set(mp["emb"])
    bias = build_bias_mask(mp["rel_bias"], BATCH, SEQ)          # (H, T, T)

    return {
        "wqk": wqk.astype(jnp.bfloat16), "wvo": wvo.astype(jnp.bfloat16),
        "wi": wi.astype(jnp.bfloat16), "wo_ff": wo_ff.astype(jnp.bfloat16),
        "ln1": ln1, "ln2": ln2, "ln_f": ln_f,
        "dw": dw, "db": db, "emb_pad": emb_pad, "bias": bias,
    }


def rankt5_forward_pallas(kp, input_ids):
    B, S = input_ids.shape
    x = kp["emb_pad"][input_ids].reshape(B * S, D_PAD)   # embedding gather glue
    return rankt5_fused_call(x, kp)                      # (B, 1)


# -------- pure-JAX f32 reference (standard unfused T5 math) ------------------
def rankt5_forward_ref(mp, input_ids):
    def rms(x, w):
        var = jnp.mean(x * x, axis=-1, keepdims=True)
        return x * jax.lax.rsqrt(var + EPS) * w

    B, S = input_ids.shape
    x = mp["emb"][input_ids]                             # (B, S, D_MODEL)
    bias = compute_position_bias(mp["rel_bias"], S)      # (H, S, S)
    for l in range(N_LAYERS):
        xn = rms(x, mp["ln1"][l])
        q = (xn @ mp["wq"][l]).reshape(B, S, N_HEADS, D_HEAD)
        k = (xn @ mp["wk"][l]).reshape(B, S, N_HEADS, D_HEAD)
        v = (xn @ mp["wv"][l]).reshape(B, S, N_HEADS, D_HEAD)
        scores = jnp.einsum("bqhd,bkhd->bhqk", q, k) + bias[None]
        probs = jax.nn.softmax(scores, axis=-1)
        ctx = jnp.einsum("bhqk,bkhd->bqhd", probs, v).reshape(B, S, D_INNER)
        x = x + ctx @ mp["wo"][l]
        xn = rms(x, mp["ln2"][l])
        x = x + jax.nn.relu(xn @ mp["wi"][l]) @ mp["wo_ff"][l]
    xn = rms(x, mp["ln_f"])
    pooled = jnp.mean(xn, axis=1)
    return pooled @ mp["dense_w"] + mp["dense_b"]


if __name__ == "__main__":
    key = jax.random.PRNGKey(0)
    pkey, ikey = jax.random.split(key)
    mp = init_master_params(pkey)
    kp = build_kernel_params(mp)      # built ONCE (bias hoisted out of forward)
    input_ids = jax.random.randint(ikey, (BATCH, SEQ), 0, VOCAB, dtype=jnp.int32)

    out = rankt5_forward_pallas(kp, input_ids)
    out = jax.block_until_ready(out)

    ref = rankt5_forward_ref(mp, input_ids)
    assert out.shape == (BATCH, 1)
    # Tolerance accounts for bf16 weight/activation MXU operands (f32 accum)
    # and the approximate (EUP) softmax reciprocal; reference is pure f32.
    np.testing.assert_allclose(np.asarray(out), np.asarray(ref),
                               rtol=2e-2, atol=5e-3)
    print("KERNEL_OK")
</pallas_src>

<mosaic_0001>
module attributes {stable_mosaic.version = 11 : i64} {
  func.func @fused_rankt5_kernel(%arg0: memref<16x128xf32, #tpu.memory_space<vmem>>, %arg1: memref<4x16x16xf32, #tpu.memory_space<vmem>>, %arg2: memref<2x128xf32, #tpu.memory_space<vmem>>, %arg3: memref<2x4x128x128xbf16, #tpu.memory_space<vmem>>, %arg4: memref<2x4x128x128xbf16, #tpu.memory_space<vmem>>, %arg5: memref<2x128xf32, #tpu.memory_space<vmem>>, %arg6: memref<2x128x128xbf16, #tpu.memory_space<vmem>>, %arg7: memref<2x128x128xbf16, #tpu.memory_space<vmem>>, %arg8: memref<1x128xf32, #tpu.memory_space<vmem>>, %arg9: memref<1x128xf32, #tpu.memory_space<vmem>>, %arg10: memref<1x1xf32, #tpu.memory_space<vmem>>, %arg11: memref<2x1xf32, #tpu.memory_space<vmem>>) attributes {dimension_semantics = [], scalar_prefetch = 0 : i64, scratch_operands = 0 : i64, tpu.core_type = #tpu.core_type<tc>} {
    %c0 = arith.constant 0 : index
    %c0_0 = arith.constant 0 : index
    %0 = vector.load %arg0[%c0, %c0_0] : memref<16x128xf32, #tpu.memory_space<vmem>>, vector<16x128xf32>
    %c0_1 = arith.constant 0 : index
    %c0_2 = arith.constant 0 : index
    %c0_3 = arith.constant 0 : index
    %1 = vector.load %arg1[%c0_1, %c0_2, %c0_3] : memref<4x16x16xf32, #tpu.memory_space<vmem>>, vector<4x16x16xf32>
    %c0_4 = arith.constant 0 : index
    %c0_5 = arith.constant 0 : index
    %2 = vector.load %arg2[%c0_4, %c0_5] : memref<2x128xf32, #tpu.memory_space<vmem>>, vector<1x128xf32>
    %3 = vector.shape_cast %2 : vector<1x128xf32> to vector<128xf32>
    %4 = arith.mulf %0, %0 : vector<16x128xf32>
    %cst = arith.constant dense<0.000000e+00> : vector<16xf32>
    %5 = vector.multi_reduction <add>, %4, %cst [1] : vector<16x128xf32> to vector<16xf32>
    %6 = vector.shape_cast %5 : vector<16xf32> to vector<16x1xf32>
    %cst_6 = arith.constant 3.125000e-02 : f32
    %7 = vector.broadcast %cst_6 : f32 to vector<16x1xf32>
    %8 = arith.mulf %6, %7 : vector<16x1xf32>
    %cst_7 = arith.constant 9.99999997E-7 : f32
    %9 = vector.broadcast %cst_7 : f32 to vector<16x1xf32>
    %10 = arith.addf %8, %9 : vector<16x1xf32>
    %11 = math.rsqrt %10 : vector<16x1xf32>
    %12 = vector.broadcast %11 : vector<16x1xf32> to vector<16x128xf32>
    %13 = arith.mulf %0, %12 : vector<16x128xf32>
    %14 = vector.shape_cast %3 : vector<128xf32> to vector<1x128xf32>
    %15 = vector.broadcast %14 : vector<1x128xf32> to vector<16x128xf32>
    %16 = arith.mulf %13, %15 : vector<16x128xf32>
    %17 = arith.truncf %16 : vector<16x128xf32> to vector<16x128xbf16>
    %cst_8 = arith.constant 0.000000e+00 : f32
    %18 = vector.broadcast %cst_8 : f32 to vector<16x128xf32>
    %c0_9 = arith.constant 0 : index
    %c0_10 = arith.constant 0 : index
    %c0_11 = arith.constant 0 : index
    %c0_12 = arith.constant 0 : index
    %19 = vector.load %arg3[%c0_9, %c0_10, %c0_11, %c0_12] : memref<2x4x128x128xbf16, #tpu.memory_space<vmem>>, vector<1x1x128x128xbf16>
    %20 = vector.shape_cast %19 : vector<1x1x128x128xbf16> to vector<128x128xbf16>
    %cst_13 = arith.constant dense<0.000000e+00> : vector<16x128xf32>
    %21 = tpu.matmul %17, %20, %cst_13 {dimension_numbers = #tpu.dot_dimension_numbers<[1], [0], [0], [1], [0, 0, 1, 1], [], []>} : vector<16x128xbf16>, vector<128x128xbf16>, vector<16x128xf32> -> vector<16x128xf32>
    %22 = tpu.transpose %16, [1, 0] : vector<16x128xf32> -> vector<128x16xf32>
    %cst_14 = arith.constant dense<0.000000e+00> : vector<16x16xf32>
    %23 = tpu.matmul %21, %22, %cst_14 {dimension_numbers = #tpu.dot_dimension_numbers<[1], [0], [0], [1], [0, 0, 1, 1], [], []>} : vector<16x128xf32>, vector<128x16xf32>, vector<16x16xf32> -> vector<16x16xf32>
    %24 = vector.extract_strided_slice %1 {offsets = [0, 0, 0], sizes = [1, 16, 16], strides = [1, 1, 1]} : vector<4x16x16xf32> to vector<1x16x16xf32>
    %25 = vector.shape_cast %24 : vector<1x16x16xf32> to vector<16x16xf32>
    %26 = arith.addf %23, %25 : vector<16x16xf32>
    %cst_15 = arith.constant dense<0xFF800000> : vector<16xf32>
    %27 = vector.multi_reduction <maximumf>, %26, %cst_15 [1] : vector<16x16xf32> to vector<16xf32>
    %28 = vector.shape_cast %27 : vector<16xf32> to vector<16x1xf32>
    %29 = vector.broadcast %28 : vector<16x1xf32> to vector<16x16xf32>
    %30 = arith.subf %26, %29 : vector<16x16xf32>
    %31 = math.exp %30 : vector<16x16xf32>
    %cst_16 = arith.constant dense<0.000000e+00> : vector<16xf32>
    %32 = vector.multi_reduction <add>, %31, %cst_16 [1] : vector<16x16xf32> to vector<16xf32>
    %33 = vector.shape_cast %32 : vector<16xf32> to vector<16x1xf32>
    %34 = tpu.reciprocal %33 {approx = true} : vector<16x1xf32> -> vector<16x1xf32>
    %35 = vector.broadcast %34 : vector<16x1xf32> to vector<16x16xf32>
    %36 = arith.mulf %31, %35 : vector<16x16xf32>
    %c0_17 = arith.constant 0 : index
    %c0_18 = arith.constant 0 : index
    %c0_19 = arith.constant 0 : index
    %c0_20 = arith.constant 0 : index
    %37 = vector.load %arg4[%c0_17, %c0_18, %c0_19, %c0_20] : memref<2x4x128x128xbf16, #tpu.memory_space<vmem>>, vector<1x1x128x128xbf16>
    %38 = vector.shape_cast %37 : vector<1x1x128x128xbf16> to vector<128x128xbf16>
    %cst_21 = arith.constant dense<0.000000e+00> : vector<16x128xf32>
    %39 = tpu.matmul %17, %38, %cst_21 {dimension_numbers = #tpu.dot_dimension_numbers<[1], [0], [0], [1], [0, 0, 1, 1], [], []>} : vector<16x128xbf16>, vector<128x128xbf16>, vector<16x128xf32> -> vector<16x128xf32>
    %cst_22 = arith.constant dense<0.000000e+00> : vector<16x128xf32>
    %40 = tpu.matmul %36, %39, %cst_22 {dimension_numbers = #tpu.dot_dimension_numbers<[1], [0], [0], [1], [0, 0, 1, 1], [], []>} : vector<16x16xf32>, vector<16x128xf32>, vector<16x128xf32> -> vector<16x128xf32>
    %41 = arith.addf %18, %40 : vector<16x128xf32>
    %c0_23 = arith.constant 0 : index
    %c1 = arith.constant 1 : index
    %c0_24 = arith.constant 0 : index
    %c0_25 = arith.constant 0 : index
    %42 = vector.load %arg3[%c0_23, %c1, %c0_24, %c0_25] : memref<2x4x128x128xbf16, #tpu.memory_space<vmem>>, vector<1x1x128x128xbf16>
    %43 = vector.shape_cast %42 : vector<1x1x128x128xbf16> to vector<128x128xbf16>
    %cst_26 = arith.constant dense<0.000000e+00> : vector<16x128xf32>
    %44 = tpu.matmul %17, %43, %cst_26 {dimension_numbers = #tpu.dot_dimension_numbers<[1], [0], [0], [1], [0, 0, 1, 1], [], []>} : vector<16x128xbf16>, vector<128x128xbf16>, vector<16x128xf32> -> vector<16x128xf32>
    %45 = tpu.transpose %16, [1, 0] : vector<16x128xf32> -> vector<128x16xf32>
    %cst_27 = arith.constant dense<0.000000e+00> : vector<16x16xf32>
    %46 = tpu.matmul %44, %45, %cst_27 {dimension_numbers = #tpu.dot_dimension_numbers<[1], [0], [0], [1], [0, 0, 1, 1], [], []>} : vector<16x128xf32>, vector<128x16xf32>, vector<16x16xf32> -> vector<16x16xf32>
    %47 = vector.extract_strided_slice %1 {offsets = [1, 0, 0], sizes = [1, 16, 16], strides = [1, 1, 1]} : vector<4x16x16xf32> to vector<1x16x16xf32>
    %48 = vector.shape_cast %47 : vector<1x16x16xf32> to vector<16x16xf32>
    %49 = arith.addf %46, %48 : vector<16x16xf32>
    %cst_28 = arith.constant dense<0xFF800000> : vector<16xf32>
    %50 = vector.multi_reduction <maximumf>, %49, %cst_28 [1] : vector<16x16xf32> to vector<16xf32>
    %51 = vector.shape_cast %50 : vector<16xf32> to vector<16x1xf32>
    %52 = vector.broadcast %51 : vector<16x1xf32> to vector<16x16xf32>
    %53 = arith.subf %49, %52 : vector<16x16xf32>
    %54 = math.exp %53 : vector<16x16xf32>
    %cst_29 = arith.constant dense<0.000000e+00> : vector<16xf32>
    %55 = vector.multi_reduction <add>, %54, %cst_29 [1] : vector<16x16xf32> to vector<16xf32>
    %56 = vector.shape_cast %55 : vector<16xf32> to vector<16x1xf32>
    %57 = tpu.reciprocal %56 {approx = true} : vector<16x1xf32> -> vector<16x1xf32>
    %58 = vector.broadcast %57 : vector<16x1xf32> to vector<16x16xf32>
    %59 = arith.mulf %54, %58 : vector<16x16xf32>
    %c0_30 = arith.constant 0 : index
    %c1_31 = arith.constant 1 : index
    %c0_32 = arith.constant 0 : index
    %c0_33 = arith.constant 0 : index
    %60 = vector.load %arg4[%c0_30, %c1_31, %c0_32, %c0_33] : memref<2x4x128x128xbf16, #tpu.memory_space<vmem>>, vector<1x1x128x128xbf16>
    %61 = vector.shape_cast %60 : vector<1x1x128x128xbf16> to vector<128x128xbf16>
    %cst_34 = arith.constant dense<0.000000e+00> : vector<16x128xf32>
    %62 = tpu.matmul %17, %61, %cst_34 {dimension_numbers = #tpu.dot_dimension_numbers<[1], [0], [0], [1], [0, 0, 1, 1], [], []>} : vector<16x128xbf16>, vector<128x128xbf16>, vector<16x128xf32> -> vector<16x128xf32>
    %cst_35 = arith.constant dense<0.000000e+00> : vector<16x128xf32>
    %63 = tpu.matmul %59, %62, %cst_35 {dimension_numbers = #tpu.dot_dimension_numbers<[1], [0], [0], [1], [0, 0, 1, 1], [], []>} : vector<16x16xf32>, vector<16x128xf32>, vector<16x128xf32> -> vector<16x128xf32>
    %64 = arith.addf %41, %63 : vector<16x128xf32>
    %c0_36 = arith.constant 0 : index
    %c2 = arith.constant 2 : index
    %c0_37 = arith.constant 0 : index
    %c0_38 = arith.constant 0 : index
    %65 = vector.load %arg3[%c0_36, %c2, %c0_37, %c0_38] : memref<2x4x128x128xbf16, #tpu.memory_space<vmem>>, vector<1x1x128x128xbf16>
    %66 = vector.shape_cast %65 : vector<1x1x128x128xbf16> to vector<128x128xbf16>
    %cst_39 = arith.constant dense<0.000000e+00> : vector<16x128xf32>
    %67 = tpu.matmul %17, %66, %cst_39 {dimension_numbers = #tpu.dot_dimension_numbers<[1], [0], [0], [1], [0, 0, 1, 1], [], []>} : vector<16x128xbf16>, vector<128x128xbf16>, vector<16x128xf32> -> vector<16x128xf32>
    %68 = tpu.transpose %16, [1, 0] : vector<16x128xf32> -> vector<128x16xf32>
    %cst_40 = arith.constant dense<0.000000e+00> : vector<16x16xf32>
    %69 = tpu.matmul %67, %68, %cst_40 {dimension_numbers = #tpu.dot_dimension_numbers<[1], [0], [0], [1], [0, 0, 1, 1], [], []>} : vector<16x128xf32>, vector<128x16xf32>, vector<16x16xf32> -> vector<16x16xf32>
    %70 = vector.extract_strided_slice %1 {offsets = [2, 0, 0], sizes = [1, 16, 16], strides = [1, 1, 1]} : vector<4x16x16xf32> to vector<1x16x16xf32>
    %71 = vector.shape_cast %70 : vector<1x16x16xf32> to vector<16x16xf32>
    %72 = arith.addf %69, %71 : vector<16x16xf32>
    %cst_41 = arith.constant dense<0xFF800000> : vector<16xf32>
    %73 = vector.multi_reduction <maximumf>, %72, %cst_41 [1] : vector<16x16xf32> to vector<16xf32>
    %74 = vector.shape_cast %73 : vector<16xf32> to vector<16x1xf32>
    %75 = vector.broadcast %74 : vector<16x1xf32> to vector<16x16xf32>
    %76 = arith.subf %72, %75 : vector<16x16xf32>
    %77 = math.exp %76 : vector<16x16xf32>
    %cst_42 = arith.constant dense<0.000000e+00> : vector<16xf32>
    %78 = vector.multi_reduction <add>, %77, %cst_42 [1] : vector<16x16xf32> to vector<16xf32>
    %79 = vector.shape_cast %78 : vector<16xf32> to vector<16x1xf32>
    %80 = tpu.reciprocal %79 {approx = true} : vector<16x1xf32> -> vector<16x1xf32>
    %81 = vector.broadcast %80 : vector<16x1xf32> to vector<16x16xf32>
    %82 = arith.mulf %77, %81 : vector<16x16xf32>
    %c0_43 = arith.constant 0 : index
    %c2_44 = arith.constant 2 : index
    %c0_45 = arith.constant 0 : index
    %c0_46 = arith.constant 0 : index
    %83 = vector.load %arg4[%c0_43, %c2_44, %c0_45, %c0_46] : memref<2x4x128x128xbf16, #tpu.memory_space<vmem>>, vector<1x1x128x128xbf16>
    %84 = vector.shape_cast %83 : vector<1x1x128x128xbf16> to vector<128x128xbf16>
    %cst_47 = arith.constant dense<0.000000e+00> : vector<16x128xf32>
    %85 = tpu.matmul %17, %84, %cst_47 {dimension_numbers = #tpu.dot_dimension_numbers<[1], [0], [0], [1], [0, 0, 1, 1], [], []>} : vector<16x128xbf16>, vector<128x128xbf16>, vector<16x128xf32> -> vector<16x128xf32>
    %cst_48 = arith.constant dense<0.000000e+00> : vector<16x128xf32>
    %86 = tpu.matmul %82, %85, %cst_48 {dimension_numbers = #tpu.dot_dimension_numbers<[1], [0], [0], [1], [0, 0, 1, 1], [], []>} : vector<16x16xf32>, vector<16x128xf32>, vector<16x128xf32> -> vector<16x128xf32>
    %87 = arith.addf %64, %86 : vector<16x128xf32>
    %c0_49 = arith.constant 0 : index
    %c3 = arith.constant 3 : index
    %c0_50 = arith.constant 0 : index
    %c0_51 = arith.constant 0 : index
    %88 = vector.load %arg3[%c0_49, %c3, %c0_50, %c0_51] : memref<2x4x128x128xbf16, #tpu.memory_space<vmem>>, vector<1x1x128x128xbf16>
    %89 = vector.shape_cast %88 : vector<1x1x128x128xbf16> to vector<128x128xbf16>
    %cst_52 = arith.constant dense<0.000000e+00> : vector<16x128xf32>
    %90 = tpu.matmul %17, %89, %cst_52 {dimension_numbers = #tpu.dot_dimension_numbers<[1], [0], [0], [1], [0, 0, 1, 1], [], []>} : vector<16x128xbf16>, vector<128x128xbf16>, vector<16x128xf32> -> vector<16x128xf32>
    %91 = tpu.transpose %16, [1, 0] : vector<16x128xf32> -> vector<128x16xf32>
    %cst_53 = arith.constant dense<0.000000e+00> : vector<16x16xf32>
    %92 = tpu.matmul %90, %91, %cst_53 {dimension_numbers = #tpu.dot_dimension_numbers<[1], [0], [0], [1], [0, 0, 1, 1], [], []>} : vector<16x128xf32>, vector<128x16xf32>, vector<16x16xf32> -> vector<16x16xf32>
    %93 = vector.extract_strided_slice %1 {offsets = [3, 0, 0], sizes = [1, 16, 16], strides = [1, 1, 1]} : vector<4x16x16xf32> to vector<1x16x16xf32>
    %94 = vector.shape_cast %93 : vector<1x16x16xf32> to vector<16x16xf32>
    %95 = arith.addf %92, %94 : vector<16x16xf32>
    %cst_54 = arith.constant dense<0xFF800000> : vector<16xf32>
    %96 = vector.multi_reduction <maximumf>, %95, %cst_54 [1] : vector<16x16xf32> to vector<16xf32>
    %97 = vector.shape_cast %96 : vector<16xf32> to vector<16x1xf32>
    %98 = vector.broadcast %97 : vector<16x1xf32> to vector<16x16xf32>
    %99 = arith.subf %95, %98 : vector<16x16xf32>
    %100 = math.exp %99 : vector<16x16xf32>
    %cst_55 = arith.constant dense<0.000000e+00> : vector<16xf32>
    %101 = vector.multi_reduction <add>, %100, %cst_55 [1] : vector<16x16xf32> to vector<16xf32>
    %102 = vector.shape_cast %101 : vector<16xf32> to vector<16x1xf32>
    %103 = tpu.reciprocal %102 {approx = true} : vector<16x1xf32> -> vector<16x1xf32>
    %104 = vector.broadcast %103 : vector<16x1xf32> to vector<16x16xf32>
    %105 = arith.mulf %100, %104 : vector<16x16xf32>
    %c0_56 = arith.constant 0 : index
    %c3_57 = arith.constant 3 : index
    %c0_58 = arith.constant 0 : index
    %c0_59 = arith.constant 0 : index
    %106 = vector.load %arg4[%c0_56, %c3_57, %c0_58, %c0_59] : memref<2x4x128x128xbf16, #tpu.memory_space<vmem>>, vector<1x1x128x128xbf16>
    %107 = vector.shape_cast %106 : vector<1x1x128x128xbf16> to vector<128x128xbf16>
    %cst_60 = arith.constant dense<0.000000e+00> : vector<16x128xf32>
    %108 = tpu.matmul %17, %107, %cst_60 {dimension_numbers = #tpu.dot_dimension_numbers<[1], [0], [0], [1], [0, 0, 1, 1], [], []>} : vector<16x128xbf16>, vector<128x128xbf16>, vector<16x128xf32> -> vector<16x128xf32>
    %cst_61 = arith.constant dense<0.000000e+00> : vector<16x128xf32>
    %109 = tpu.matmul %105, %108, %cst_61 {dimension_numbers = #tpu.dot_dimension_numbers<[1], [0], [0], [1], [0, 0, 1, 1], [], []>} : vector<16x16xf32>, vector<16x128xf32>, vector<16x128xf32> -> vector<16x128xf32>
    %110 = arith.addf %87, %109 : vector<16x128xf32>
    %111 = arith.addf %0, %110 : vector<16x128xf32>
    %c0_62 = arith.constant 0 : index
    %c0_63 = arith.constant 0 : index
    %112 = vector.load %arg5[%c0_62, %c0_63] : memref<2x128xf32, #tpu.memory_space<vmem>>, vector<1x128xf32>
    %113 = vector.shape_cast %112 : vector<1x128xf32> to vector<128xf32>
    %114 = arith.mulf %111, %111 : vector<16x128xf32>
    %cst_64 = arith.constant dense<0.000000e+00> : vector<16xf32>
    %115 = vector.multi_reduction <add>, %114, %cst_64 [1] : vector<16x128xf32> to vector<16xf32>
    %116 = vector.shape_cast %115 : vector<16xf32> to vector<16x1xf32>
    %cst_65 = arith.constant 3.125000e-02 : f32
    %117 = vector.broadcast %cst_65 : f32 to vector<16x1xf32>
    %118 = arith.mulf %116, %117 : vector<16x1xf32>
    %cst_66 = arith.constant 9.99999997E-7 : f32
    %119 = vector.broadcast %cst_66 : f32 to vector<16x1xf32>
    %120 = arith.addf %118, %119 : vector<16x1xf32>
    %121 = math.rsqrt %120 : vector<16x1xf32>
    %122 = vector.broadcast %121 : vector<16x1xf32> to vector<16x128xf32>
    %123 = arith.mulf %111, %122 : vector<16x128xf32>
    %124 = vector.shape_cast %113 : vector<128xf32> to vector<1x128xf32>
    %125 = vector.broadcast %124 : vector<1x128xf32> to vector<16x128xf32>
    %126 = arith.mulf %123, %125 : vector<16x128xf32>
    %127 = arith.truncf %126 : vector<16x128xf32> to vector<16x128xbf16>
    %c0_67 = arith.constant 0 : index
    %c0_68 = arith.constant 0 : index
    %c0_69 = arith.constant 0 : index
    %128 = vector.load %arg6[%c0_67, %c0_68, %c0_69] : memref<2x128x128xbf16, #tpu.memory_space<vmem>>, vector<1x128x128xbf16>
    %129 = vector.shape_cast %128 : vector<1x128x128xbf16> to vector<128x128xbf16>
    %cst_70 = arith.constant dense<0.000000e+00> : vector<16x128xf32>
    %130 = tpu.matmul %127, %129, %cst_70 {dimension_numbers = #tpu.dot_dimension_numbers<[1], [0], [0], [1], [0, 0, 1, 1], [], []>} : vector<16x128xbf16>, vector<128x128xbf16>, vector<16x128xf32> -> vector<16x128xf32>
    %cst_71 = arith.constant 0.000000e+00 : f32
    %131 = vector.broadcast %cst_71 : f32 to vector<16x128xf32>
    %132 = arith.maximumf %130, %131 : vector<16x128xf32>
    %133 = arith.truncf %132 : vector<16x128xf32> to vector<16x128xbf16>
    %c0_72 = arith.constant 0 : index
    %c0_73 = arith.constant 0 : index
    %c0_74 = arith.constant 0 : index
    %134 = vector.load %arg7[%c0_72, %c0_73, %c0_74] : memref<2x128x128xbf16, #tpu.memory_space<vmem>>, vector<1x128x128xbf16>
    %135 = vector.shape_cast %134 : vector<1x128x128xbf16> to vector<128x128xbf16>
    %cst_75 = arith.constant dense<0.000000e+00> : vector<16x128xf32>
    %136 = tpu.matmul %133, %135, %cst_75 {dimension_numbers = #tpu.dot_dimension_numbers<[1], [0], [0], [1], [0, 0, 1, 1], [], []>} : vector<16x128xbf16>, vector<128x128xbf16>, vector<16x128xf32> -> vector<16x128xf32>
    %137 = arith.addf %111, %136 : vector<16x128xf32>
    %c1_76 = arith.constant 1 : index
    %c0_77 = arith.constant 0 : index
    %138 = vector.load %arg2[%c1_76, %c0_77] : memref<2x128xf32, #tpu.memory_space<vmem>>, vector<1x128xf32>
    %139 = vector.shape_cast %138 : vector<1x128xf32> to vector<128xf32>
    %140 = arith.mulf %137, %137 : vector<16x128xf32>
    %cst_78 = arith.constant dense<0.000000e+00> : vector<16xf32>
    %141 = vector.multi_reduction <add>, %140, %cst_78 [1] : vector<16x128xf32> to vector<16xf32>
    %142 = vector.shape_cast %141 : vector<16xf32> to vector<16x1xf32>
    %cst_79 = arith.constant 3.125000e-02 : f32
    %143 = vector.broadcast %cst_79 : f32 to vector<16x1xf32>
    %144 = arith.mulf %142, %143 : vector<16x1xf32>
    %cst_80 = arith.constant 9.99999997E-7 : f32
    %145 = vector.broadcast %cst_80 : f32 to vector<16x1xf32>
    %146 = arith.addf %144, %145 : vector<16x1xf32>
    %147 = math.rsqrt %146 : vector<16x1xf32>
    %148 = vector.broadcast %147 : vector<16x1xf32> to vector<16x128xf32>
    %149 = arith.mulf %137, %148 : vector<16x128xf32>
    %150 = vector.shape_cast %139 : vector<128xf32> to vector<1x128xf32>
    %151 = vector.broadcast %150 : vector<1x128xf32> to vector<16x128xf32>
    %152 = arith.mulf %149, %151 : vector<16x128xf32>
    %153 = arith.truncf %152 : vector<16x128xf32> to vector<16x128xbf16>
    %cst_81 = arith.constant 0.000000e+00 : f32
    %154 = vector.broadcast %cst_81 : f32 to vector<16x128xf32>
    %c1_82 = arith.constant 1 : index
    %c0_83 = arith.constant 0 : index
    %c0_84 = arith.constant 0 : index
    %c0_85 = arith.constant 0 : index
    %155 = vector.load %arg3[%c1_82, %c0_83, %c0_84, %c0_85] : memref<2x4x128x128xbf16, #tpu.memory_space<vmem>>, vector<1x1x128x128xbf16>
    %156 = vector.shape_cast %155 : vector<1x1x128x128xbf16> to vector<128x128xbf16>
    %cst_86 = arith.constant dense<0.000000e+00> : vector<16x128xf32>
    %157 = tpu.matmul %153, %156, %cst_86 {dimension_numbers = #tpu.dot_dimension_numbers<[1], [0], [0], [1], [0, 0, 1, 1], [], []>} : vector<16x128xbf16>, vector<128x128xbf16>, vector<16x128xf32> -> vector<16x128xf32>
    %158 = tpu.transpose %152, [1, 0] : vector<16x128xf32> -> vector<128x16xf32>
    %cst_87 = arith.constant dense<0.000000e+00> : vector<16x16xf32>
    %159 = tpu.matmul %157, %158, %cst_87 {dimension_numbers = #tpu.dot_dimension_numbers<[1], [0], [0], [1], [0, 0, 1, 1], [], []>} : vector<16x128xf32>, vector<128x16xf32>, vector<16x16xf32> -> vector<16x16xf32>
    %160 = vector.extract_strided_slice %1 {offsets = [0, 0, 0], sizes = [1, 16, 16], strides = [1, 1, 1]} : vector<4x16x16xf32> to vector<1x16x16xf32>
    %161 = vector.shape_cast %160 : vector<1x16x16xf32> to vector<16x16xf32>
    %162 = arith.addf %159, %161 : vector<16x16xf32>
    %cst_88 = arith.constant dense<0xFF800000> : vector<16xf32>
    %163 = vector.multi_reduction <maximumf>, %162, %cst_88 [1] : vector<16x16xf32> to vector<16xf32>
    %164 = vector.shape_cast %163 : vector<16xf32> to vector<16x1xf32>
    %165 = vector.broadcast %164 : vector<16x1xf32> to vector<16x16xf32>
    %166 = arith.subf %162, %165 : vector<16x16xf32>
    %167 = math.exp %166 : vector<16x16xf32>
    %cst_89 = arith.constant dense<0.000000e+00> : vector<16xf32>
    %168 = vector.multi_reduction <add>, %167, %cst_89 [1] : vector<16x16xf32> to vector<16xf32>
    %169 = vector.shape_cast %168 : vector<16xf32> to vector<16x1xf32>
    %170 = tpu.reciprocal %169 {approx = true} : vector<16x1xf32> -> vector<16x1xf32>
    %171 = vector.broadcast %170 : vector<16x1xf32> to vector<16x16xf32>
    %172 = arith.mulf %167, %171 : vector<16x16xf32>
    %c1_90 = arith.constant 1 : index
    %c0_91 = arith.constant 0 : index
    %c0_92 = arith.constant 0 : index
    %c0_93 = arith.constant 0 : index
    %173 = vector.load %arg4[%c1_90, %c0_91, %c0_92, %c0_93] : memref<2x4x128x128xbf16, #tpu.memory_space<vmem>>, vector<1x1x128x128xbf16>
    %174 = vector.shape_cast %173 : vector<1x1x128x128xbf16> to vector<128x128xbf16>
    %cst_94 = arith.constant dense<0.000000e+00> : vector<16x128xf32>
    %175 = tpu.matmul %153, %174, %cst_94 {dimension_numbers = #tpu.dot_dimension_numbers<[1], [0], [0], [1], [0, 0, 1, 1], [], []>} : vector<16x128xbf16>, vector<128x128xbf16>, vector<16x128xf32> -> vector<16x128xf32>
    %cst_95 = arith.constant dense<0.000000e+00> : vector<16x128xf32>
    %176 = tpu.matmul %172, %175, %cst_95 {dimension_numbers = #tpu.dot_dimension_numbers<[1], [0], [0], [1], [0, 0, 1, 1], [], []>} : vector<16x16xf32>, vector<16x128xf32>, vector<16x128xf32> -> vector<16x128xf32>
    %177 = arith.addf %154, %176 : vector<16x128xf32>
    %c1_96 = arith.constant 1 : index
    %c1_97 = arith.constant 1 : index
    %c0_98 = arith.constant 0 : index
    %c0_99 = arith.constant 0 : index
    %178 = vector.load %arg3[%c1_96, %c1_97, %c0_98, %c0_99] : memref<2x4x128x128xbf16, #tpu.memory_space<vmem>>, vector<1x1x128x128xbf16>
    %179 = vector.shape_cast %178 : vector<1x1x128x128xbf16> to vector<128x128xbf16>
    %cst_100 = arith.constant dense<0.000000e+00> : vector<16x128xf32>
    %180 = tpu.matmul %153, %179, %cst_100 {dimension_numbers = #tpu.dot_dimension_numbers<[1], [0], [0], [1], [0, 0, 1, 1], [], []>} : vector<16x128xbf16>, vector<128x128xbf16>, vector<16x128xf32> -> vector<16x128xf32>
    %181 = tpu.transpose %152, [1, 0] : vector<16x128xf32> -> vector<128x16xf32>
    %cst_101 = arith.constant dense<0.000000e+00> : vector<16x16xf32>
    %182 = tpu.matmul %180, %181, %cst_101 {dimension_numbers = #tpu.dot_dimension_numbers<[1], [0], [0], [1], [0, 0, 1, 1], [], []>} : vector<16x128xf32>, vector<128x16xf32>, vector<16x16xf32> -> vector<16x16xf32>
    %183 = vector.extract_strided_slice %1 {offsets = [1, 0, 0], sizes = [1, 16, 16], strides = [1, 1, 1]} : vector<4x16x16xf32> to vector<1x16x16xf32>
    %184 = vector.shape_cast %183 : vector<1x16x16xf32> to vector<16x16xf32>
    %185 = arith.addf %182, %184 : vector<16x16xf32>
    %cst_102 = arith.constant dense<0xFF800000> : vector<16xf32>
    %186 = vector.multi_reduction <maximumf>, %185, %cst_102 [1] : vector<16x16xf32> to vector<16xf32>
    %187 = vector.shape_cast %186 : vector<16xf32> to vector<16x1xf32>
    %188 = vector.broadcast %187 : vector<16x1xf32> to vector<16x16xf32>
    %189 = arith.subf %185, %188 : vector<16x16xf32>
    %190 = math.exp %189 : vector<16x16xf32>
    %cst_103 = arith.constant dense<0.000000e+00> : vector<16xf32>
    %191 = vector.multi_reduction <add>, %190, %cst_103 [1] : vector<16x16xf32> to vector<16xf32>
    %192 = vector.shape_cast %191 : vector<16xf32> to vector<16x1xf32>
    %193 = tpu.reciprocal %192 {approx = true} : vector<16x1xf32> -> vector<16x1xf32>
    %194 = vector.broadcast %193 : vector<16x1xf32> to vector<16x16xf32>
    %195 = arith.mulf %190, %194 : vector<16x16xf32>
    %c1_104 = arith.constant 1 : index
    %c1_105 = arith.constant 1 : index
    %c0_106 = arith.constant 0 : index
    %c0_107 = arith.constant 0 : index
    %196 = vector.load %arg4[%c1_104, %c1_105, %c0_106, %c0_107] : memref<2x4x128x128xbf16, #tpu.memory_space<vmem>>, vector<1x1x128x128xbf16>
    %197 = vector.shape_cast %196 : vector<1x1x128x128xbf16> to vector<128x128xbf16>
    %cst_108 = arith.constant dense<0.000000e+00> : vector<16x128xf32>
    %198 = tpu.matmul %153, %197, %cst_108 {dimension_numbers = #tpu.dot_dimension_numbers<[1], [0], [0], [1], [0, 0, 1, 1], [], []>} : vector<16x128xbf16>, vector<128x128xbf16>, vector<16x128xf32> -> vector<16x128xf32>
    %cst_109 = arith.constant dense<0.000000e+00> : vector<16x128xf32>
    %199 = tpu.matmul %195, %198, %cst_109 {dimension_numbers = #tpu.dot_dimension_numbers<[1], [0], [0], [1], [0, 0, 1, 1], [], []>} : vector<16x16xf32>, vector<16x128xf32>, vector<16x128xf32> -> vector<16x128xf32>
    %200 = arith.addf %177, %199 : vector<16x128xf32>
    %c1_110 = arith.constant 1 : index
    %c2_111 = arith.constant 2 : index
    %c0_112 = arith.constant 0 : index
    %c0_113 = arith.constant 0 : index
    %201 = vector.load %arg3[%c1_110, %c2_111, %c0_112, %c0_113] : memref<2x4x128x128xbf16, #tpu.memory_space<vmem>>, vector<1x1x128x128xbf16>
    %202 = vector.shape_cast %201 : vector<1x1x128x128xbf16> to vector<128x128xbf16>
    %cst_114 = arith.constant dense<0.000000e+00> : vector<16x128xf32>
    %203 = tpu.matmul %153, %202, %cst_114 {dimension_numbers = #tpu.dot_dimension_numbers<[1], [0], [0], [1], [0, 0, 1, 1], [], []>} : vector<16x128xbf16>, vector<128x128xbf16>, vector<16x128xf32> -> vector<16x128xf32>
    %204 = tpu.transpose %152, [1, 0] : vector<16x128xf32> -> vector<128x16xf32>
    %cst_115 = arith.constant dense<0.000000e+00> : vector<16x16xf32>
    %205 = tpu.matmul %203, %204, %cst_115 {dimension_numbers = #tpu.dot_dimension_numbers<[1], [0], [0], [1], [0, 0, 1, 1], [], []>} : vector<16x128xf32>, vector<128x16xf32>, vector<16x16xf32> -> vector<16x16xf32>
    %206 = vector.extract_strided_slice %1 {offsets = [2, 0, 0], sizes = [1, 16, 16], strides = [1, 1, 1]} : vector<4x16x16xf32> to vector<1x16x16xf32>
    %207 = vector.shape_cast %206 : vector<1x16x16xf32> to vector<16x16xf32>
    %208 = arith.addf %205, %207 : vector<16x16xf32>
    %cst_116 = arith.constant dense<0xFF800000> : vector<16xf32>
    %209 = vector.multi_reduction <maximumf>, %208, %cst_116 [1] : vector<16x16xf32> to vector<16xf32>
    %210 = vector.shape_cast %209 : vector<16xf32> to vector<16x1xf32>
    %211 = vector.broadcast %210 : vector<16x1xf32> to vector<16x16xf32>
    %212 = arith.subf %208, %211 : vector<16x16xf32>
    %213 = math.exp %212 : vector<16x16xf32>
    %cst_117 = arith.constant dense<0.000000e+00> : vector<16xf32>
    %214 = vector.multi_reduction <add>, %213, %cst_117 [1] : vector<16x16xf32> to vector<16xf32>
    %215 = vector.shape_cast %214 : vector<16xf32> to vector<16x1xf32>
    %216 = tpu.reciprocal %215 {approx = true} : vector<16x1xf32> -> vector<16x1xf32>
    %217 = vector.broadcast %216 : vector<16x1xf32> to vector<16x16xf32>
    %218 = arith.mulf %213, %217 : vector<16x16xf32>
    %c1_118 = arith.constant 1 : index
    %c2_119 = arith.constant 2 : index
    %c0_120 = arith.constant 0 : index
    %c0_121 = arith.constant 0 : index
    %219 = vector.load %arg4[%c1_118, %c2_119, %c0_120, %c0_121] : memref<2x4x128x128xbf16, #tpu.memory_space<vmem>>, vector<1x1x128x128xbf16>
    %220 = vector.shape_cast %219 : vector<1x1x128x128xbf16> to vector<128x128xbf16>
    %cst_122 = arith.constant dense<0.000000e+00> : vector<16x128xf32>
    %221 = tpu.matmul %153, %220, %cst_122 {dimension_numbers = #tpu.dot_dimension_numbers<[1], [0], [0], [1], [0, 0, 1, 1], [], []>} : vector<16x128xbf16>, vector<128x128xbf16>, vector<16x128xf32> -> vector<16x128xf32>
    %cst_123 = arith.constant dense<0.000000e+00> : vector<16x128xf32>
    %222 = tpu.matmul %218, %221, %cst_123 {dimension_numbers = #tpu.dot_dimension_numbers<[1], [0], [0], [1], [0, 0, 1, 1], [], []>} : vector<16x16xf32>, vector<16x128xf32>, vector<16x128xf32> -> vector<16x128xf32>
    %223 = arith.addf %200, %222 : vector<16x128xf32>
    %c1_124 = arith.constant 1 : index
    %c3_125 = arith.constant 3 : index
    %c0_126 = arith.constant 0 : index
    %c0_127 = arith.constant 0 : index
    %224 = vector.load %arg3[%c1_124, %c3_125, %c0_126, %c0_127] : memref<2x4x128x128xbf16, #tpu.memory_space<vmem>>, vector<1x1x128x128xbf16>
    %225 = vector.shape_cast %224 : vector<1x1x128x128xbf16> to vector<128x128xbf16>
    %cst_128 = arith.constant dense<0.000000e+00> : vector<16x128xf32>
    %226 = tpu.matmul %153, %225, %cst_128 {dimension_numbers = #tpu.dot_dimension_numbers<[1], [0], [0], [1], [0, 0, 1, 1], [], []>} : vector<16x128xbf16>, vector<128x128xbf16>, vector<16x128xf32> -> vector<16x128xf32>
    %227 = tpu.transpose %152, [1, 0] : vector<16x128xf32> -> vector<128x16xf32>
    %cst_129 = arith.constant dense<0.000000e+00> : vector<16x16xf32>
    %228 = tpu.matmul %226, %227, %cst_129 {dimension_numbers = #tpu.dot_dimension_numbers<[1], [0], [0], [1], [0, 0, 1, 1], [], []>} : vector<16x128xf32>, vector<128x16xf32>, vector<16x16xf32> -> vector<16x16xf32>
    %229 = vector.extract_strided_slice %1 {offsets = [3, 0, 0], sizes = [1, 16, 16], strides = [1, 1, 1]} : vector<4x16x16xf32> to vector<1x16x16xf32>
    %230 = vector.shape_cast %229 : vector<1x16x16xf32> to vector<16x16xf32>
    %231 = arith.addf %228, %230 : vector<16x16xf32>
    %cst_130 = arith.constant dense<0xFF800000> : vector<16xf32>
    %232 = vector.multi_reduction <maximumf>, %231, %cst_130 [1] : vector<16x16xf32> to vector<16xf32>
    %233 = vector.shape_cast %232 : vector<16xf32> to vector<16x1xf32>
    %234 = vector.broadcast %233 : vector<16x1xf32> to vector<16x16xf32>
    %235 = arith.subf %231, %234 : vector<16x16xf32>
    %236 = math.exp %235 : vector<16x16xf32>
    %cst_131 = arith.constant dense<0.000000e+00> : vector<16xf32>
    %237 = vector.multi_reduction <add>, %236, %cst_131 [1] : vector<16x16xf32> to vector<16xf32>
    %238 = vector.shape_cast %237 : vector<16xf32> to vector<16x1xf32>
    %239 = tpu.reciprocal %238 {approx = true} : vector<16x1xf32> -> vector<16x1xf32>
    %240 = vector.broadcast %239 : vector<16x1xf32> to vector<16x16xf32>
    %241 = arith.mulf %236, %240 : vector<16x16xf32>
    %c1_132 = arith.constant 1 : index
    %c3_133 = arith.constant 3 : index
    %c0_134 = arith.constant 0 : index
    %c0_135 = arith.constant 0 : index
    %242 = vector.load %arg4[%c1_132, %c3_133, %c0_134, %c0_135] : memref<2x4x128x128xbf16, #tpu.memory_space<vmem>>, vector<1x1x128x128xbf16>
    %243 = vector.shape_cast %242 : vector<1x1x128x128xbf16> to vector<128x128xbf16>
    %cst_136 = arith.constant dense<0.000000e+00> : vector<16x128xf32>
    %244 = tpu.matmul %153, %243, %cst_136 {dimension_numbers = #tpu.dot_dimension_numbers<[1], [0], [0], [1], [0, 0, 1, 1], [], []>} : vector<16x128xbf16>, vector<128x128xbf16>, vector<16x128xf32> -> vector<16x128xf32>
    %cst_137 = arith.constant dense<0.000000e+00> : vector<16x128xf32>
    %245 = tpu.matmul %241, %244, %cst_137 {dimension_numbers = #tpu.dot_dimension_numbers<[1], [0], [0], [1], [0, 0, 1, 1], [], []>} : vector<16x16xf32>, vector<16x128xf32>, vector<16x128xf32> -> vector<16x128xf32>
    %246 = arith.addf %223, %245 : vector<16x128xf32>
    %247 = arith.addf %137, %246 : vector<16x128xf32>
    %c1_138 = arith.constant 1 : index
    %c0_139 = arith.constant 0 : index
    %248 = vector.load %arg5[%c1_138, %c0_139] : memref<2x128xf32, #tpu.memory_space<vmem>>, vector<1x128xf32>
    %249 = vector.shape_cast %248 : vector<1x128xf32> to vector<128xf32>
    %250 = arith.mulf %247, %247 : vector<16x128xf32>
    %cst_140 = arith.constant dense<0.000000e+00> : vector<16xf32>
    %251 = vector.multi_reduction <add>, %250, %cst_140 [1] : vector<16x128xf32> to vector<16xf32>
    %252 = vector.shape_cast %251 : vector<16xf32> to vector<16x1xf32>
    %cst_141 = arith.constant 3.125000e-02 : f32
    %253 = vector.broadcast %cst_141 : f32 to vector<16x1xf32>
    %254 = arith.mulf %252, %253 : vector<16x1xf32>
    %cst_142 = arith.constant 9.99999997E-7 : f32
    %255 = vector.broadcast %cst_142 : f32 to vector<16x1xf32>
    %256 = arith.addf %254, %255 : vector<16x1xf32>
    %257 = math.rsqrt %256 : vector<16x1xf32>
    %258 = vector.broadcast %257 : vector<16x1xf32> to vector<16x128xf32>
    %259 = arith.mulf %247, %258 : vector<16x128xf32>
    %260 = vector.shape_cast %249 : vector<128xf32> to vector<1x128xf32>
    %261 = vector.broadcast %260 : vector<1x128xf32> to vector<16x128xf32>
    %262 = arith.mulf %259, %261 : vector<16x128xf32>
    %263 = arith.truncf %262 : vector<16x128xf32> to vector<16x128xbf16>
    %c1_143 = arith.constant 1 : index
    %c0_144 = arith.constant 0 : index
    %c0_145 = arith.constant 0 : index
    %264 = vector.load %arg6[%c1_143, %c0_144, %c0_145] : memref<2x128x128xbf16, #tpu.memory_space<vmem>>, vector<1x128x128xbf16>
    %265 = vector.shape_cast %264 : vector<1x128x128xbf16> to vector<128x128xbf16>
    %cst_146 = arith.constant dense<0.000000e+00> : vector<16x128xf32>
    %266 = tpu.matmul %263, %265, %cst_146 {dimension_numbers = #tpu.dot_dimension_numbers<[1], [0], [0], [1], [0, 0, 1, 1], [], []>} : vector<16x128xbf16>, vector<128x128xbf16>, vector<16x128xf32> -> vector<16x128xf32>
    %cst_147 = arith.constant 0.000000e+00 : f32
    %267 = vector.broadcast %cst_147 : f32 to vector<16x128xf32>
    %268 = arith.maximumf %266, %267 : vector<16x128xf32>
    %269 = arith.truncf %268 : vector<16x128xf32> to vector<16x128xbf16>
    %c1_148 = arith.constant 1 : index
    %c0_149 = arith.constant 0 : index
    %c0_150 = arith.constant 0 : index
    %270 = vector.load %arg7[%c1_148, %c0_149, %c0_150] : memref<2x128x128xbf16, #tpu.memory_space<vmem>>, vector<1x128x128xbf16>
    %271 = vector.shape_cast %270 : vector<1x128x128xbf16> to vector<128x128xbf16>
    %cst_151 = arith.constant dense<0.000000e+00> : vector<16x128xf32>
    %272 = tpu.matmul %269, %271, %cst_151 {dimension_numbers = #tpu.dot_dimension_numbers<[1], [0], [0], [1], [0, 0, 1, 1], [], []>} : vector<16x128xbf16>, vector<128x128xbf16>, vector<16x128xf32> -> vector<16x128xf32>
    %273 = arith.addf %247, %272 : vector<16x128xf32>
    %c0_152 = arith.constant 0 : index
    %c0_153 = arith.constant 0 : index
    %274 = vector.load %arg8[%c0_152, %c0_153] : memref<1x128xf32, #tpu.memory_space<vmem>>, vector<1x128xf32>
    %275 = vector.shape_cast %274 : vector<1x128xf32> to vector<128xf32>
    %276 = arith.mulf %273, %273 : vector<16x128xf32>
    %cst_154 = arith.constant dense<0.000000e+00> : vector<16xf32>
    %277 = vector.multi_reduction <add>, %276, %cst_154 [1] : vector<16x128xf32> to vector<16xf32>
    %278 = vector.shape_cast %277 : vector<16xf32> to vector<16x1xf32>
    %cst_155 = arith.constant 3.125000e-02 : f32
    %279 = vector.broadcast %cst_155 : f32 to vector<16x1xf32>
    %280 = arith.mulf %278, %279 : vector<16x1xf32>
    %cst_156 = arith.constant 9.99999997E-7 : f32
    %281 = vector.broadcast %cst_156 : f32 to vector<16x1xf32>
    %282 = arith.addf %280, %281 : vector<16x1xf32>
    %283 = math.rsqrt %282 : vector<16x1xf32>
    %284 = vector.broadcast %283 : vector<16x1xf32> to vector<16x128xf32>
    %285 = arith.mulf %273, %284 : vector<16x128xf32>
    %286 = vector.shape_cast %275 : vector<128xf32> to vector<1x128xf32>
    %287 = vector.broadcast %286 : vector<1x128xf32> to vector<16x128xf32>
    %288 = arith.mulf %285, %287 : vector<16x128xf32>
    %289 = vector.shape_cast %288 : vector<16x128xf32> to vector<2x8x128xf32>
    %cst_157 = arith.constant dense<0.000000e+00> : vector<2x128xf32>
    %290 = vector.multi_reduction <add>, %289, %cst_157 [1] : vector<2x8x128xf32> to vector<2x128xf32>
    %cst_158 = arith.constant 8.000000e+00 : f32
    %291 = vector.broadcast %cst_158 : f32 to vector<2x128xf32>
    %292 = arith.divf %290, %291 : vector<2x128xf32>
    %c0_159 = arith.constant 0 : index
    %c0_160 = arith.constant 0 : index
    %293 = vector.load %arg9[%c0_159, %c0_160] : memref<1x128xf32, #tpu.memory_space<vmem>>, vector<1x128xf32>
    %294 = vector.broadcast %293 : vector<1x128xf32> to vector<2x128xf32>
    %295 = arith.mulf %292, %294 : vector<2x128xf32>
    %cst_161 = arith.constant dense<0.000000e+00> : vector<2xf32>
    %296 = vector.multi_reduction <add>, %295, %cst_161 [1] : vector<2x128xf32> to vector<2xf32>
    %297 = vector.shape_cast %296 : vector<2xf32> to vector<2x1xf32>
    %c0_162 = arith.constant 0 : index
    %c0_163 = arith.constant 0 : index
    %298 = vector.load %arg10[%c0_162, %c0_163] : memref<1x1xf32, #tpu.memory_space<vmem>>, vector<1x1xf32>
    %299 = vector.broadcast %298 : vector<1x1xf32> to vector<2x1xf32>
    %300 = arith.addf %297, %299 : vector<2x1xf32>
    %c0_164 = arith.constant 0 : index
    %c0_165 = arith.constant 0 : index
    %301 = vector.load %arg11[%c0_164, %c0_165] : memref<2x1xf32, #tpu.memory_space<vmem>>, vector<2x1xf32>
    tpu.vector_store %arg11[%c0_164, %c0_165], %300 {strides = array<i32>} : memref<2x1xf32, #tpu.memory_space<vmem>>, vector<2x1xf32>,
    return
  }
}

</mosaic_0001>

<bundles_post_ra>
// kernel: tpu_custom_call.1
= control target key start
LH: loop header
LB: loop body
LE: loop exit
PB: predicated region body
PF: predicated region fallthrough
CT: control target
= control target key end

     0   :  { %s5809_s0 = inlined_call_operand.hbm [shape: f32[16,128], index: 0, kind: input, shape index: {}]   ;;  %s5810_s1 = inlined_call_operand.hbm [shape: f32[4,16,16], index: 1, kind: input, shape index: {}]   ;;  %s5811_s2 = inlined_call_operand.vmem [shape: f32[2,128], index: 2, kind: input, shape index: {}]   ;;  %s5812_s3 = inlined_call_operand.hbm [shape: bf16[2,4,128,128], index: 3, kind: input, shape index: {}]   ;;  %s5813_s4 = inlined_call_operand.hbm [shape: bf16[2,4,128,128], index: 4, kind: input, shape index: {}]   ;;  %s5814_s5 = inlined_call_operand.vmem [shape: f32[2,128], index: 5, kind: input, shape index: {}]   ;;  %s5815_s6 = inlined_call_operand.hbm [shape: bf16[2,128,128], index: 6, kind: input, shape index: {}]   ;;  %s5816_s7 = inlined_call_operand.hbm [shape: bf16[2,128,128], index: 7, kind: input, shape index: {}]   ;;  %s5817_s8 = inlined_call_operand.vmem [shape: f32[1,128], index: 8, kind: input, shape index: {}]   ;;  %s5818_s9 = inlined_call_operand.vmem [shape: f32[1,128], index: 9, kind: input, shape index: {}]   ;;  %s5819_s10 = inlined_call_operand.<no memory space> [shape: f32[1,1], index: 10, kind: input, shape index: {}]   ;;  %s5820_s11 = inlined_call_operand.vmem [shape: f32[2,1], index: 11, kind: output, shape index: {}]  }
   0x1   :  { %v16_v0 = vstv %s5819_s10 }
   0x2   :  { %17 = vst [vmem:[#allocation2] sm:$0x1] %v16_v0 }
   0x3   :  { %18 = vsyncpa [#allocation4], 0 }
   0x4   :  { %19 = vsyncpa [#allocation6], 0 }
   0x5   :  { %20 = vsyncpa [#allocation9], 0 }
   0x6   :  { %21 = vsyncpa [#allocation12], 0  ;;  %s5275_s19 = smov [#allocation5]   ;;  %s5135_s23 = scalar_lea.hbm %s5810_s1, 1024 }
   0x7   :  { %s39_s20 = sshll.u32 %s5275_s19, 4  ;;  %p5136_p0 = scmp.ne.s32.totalorder %s5810_s1, %s5135_s23  ;;  %s40_s20 = int_to_ptr.vmem [resolvable:$true] %s39_s20 }
   0x8   :  { %p5139_p1 = scmp.lt.u32.totalorder %s5135_s23, %s5810_s1 }
   0xa   :  { %p5141_p2 = pnand %p5139_p1, %p5136_p0 }
   0xc   :  { %5144 = shalt.err (!%p5141_p2)
}
   0xd   :  { %s5145_s10 = scalar_lea.vmem %s40_s20, 1024  ;;  %p5150_p4 = scmp.lt.s32.totalorder %s40_s20, %s40_s20 }
   0xe   :  { %p5146_p3 = scmp.ne.s32.totalorder %s40_s20, %s5145_s10  ;;  %p5151_p5 = scmp.lt.s32.totalorder %s5145_s10, %s5145_s10 }
  0x10   :  { %p5152_p6 = por %p5151_p5, %p5150_p4 }
  0x12   :  { %p5153_p7 = pnand %p5152_p6, %p5146_p3 }
  0x14   :  { %5156 = shalt.err (!%p5153_p7)
}
  0x15   :  { %s5276_s28 = smov 128   ;;  %s5277_s29 = smov 8  }
  0x16   :  { %45 = dma.hbm_to_vmem [thread:$0]  %s5810_s1, 1024, %s40_s20, [#allocation6], %s5276_s28, %s5276_s28, %s5277_s29  }
  0x17   :  { %s5278_s13 = smov [#allocation8]   ;;  %s5279_s15 = smov [#allocation3]  }
  0x18   :  { %s65_s14 = sshll.u32 %s5278_s13, 4  ;;  %s27_s16 = sshll.u32 %s5279_s15, 4  ;;  %s66_s14 = int_to_ptr.vmem [resolvable:$true] %s65_s14  ;;  %s28_s16 = int_to_ptr.vmem [resolvable:$true] %s27_s16 }
  0x19   :  { %s5157_s19 = scalar_lea.hbm %s5813_s4, 8192 }
  0x1a   :  { %p5158_p8 = scmp.ne.s32.totalorder %s5813_s4, %s5157_s19  ;;  %p5161_p9 = scmp.lt.u32.totalorder %s5157_s19, %s5813_s4 }
  0x1c   :  { %p5163_p10 = pnand %p5161_p9, %p5158_p8 }
  0x1e   :  { %5166 = shalt.err (!%p5163_p10)
}
  0x1f   :  { %s5167_s1 = scalar_lea.vmem %s66_s14, 8192  ;;  %p5172_p12 = scmp.lt.s32.totalorder %s66_s14, %s66_s14 }
  0x20   :  { %p5168_p11 = scmp.ne.s32.totalorder %s66_s14, %s5167_s1  ;;  %p5173_p13 = scmp.lt.s32.totalorder %s5167_s1, %s5167_s1 }
  0x22   :  { %p5174_p0 = por %p5173_p13, %p5172_p12 }
  0x24   :  { %p5175_p1 = pnand %p5174_p0, %p5168_p11 }
  0x26   :  { %5178 = shalt.err (!%p5175_p1)
}
  0x27   :  { %s5280_s20 = smov 64   ;;  %s5281_s25 = smov 4  }
  0x28   :  { %71 = dma.hbm_to_vmem [thread:$0]  %s5813_s4, 8192, %s66_s14, [#allocation9], %s5280_s20, %s5280_s20, %s5281_s25  }
  0x29   :  { %s5179_s12 = scalar_lea.hbm %s5809_s0, 256 }
  0x2a   :  { %p5180_p2 = scmp.ne.s32.totalorder %s5809_s0, %s5179_s12  ;;  %p5183_p3 = scmp.lt.u32.totalorder %s5179_s12, %s5809_s0 }
  0x2c   :  { %p5185_p4 = pnand %p5183_p3, %p5180_p2 }
  0x2e   :  { %5188 = shalt.err (!%p5185_p4)
}
  0x2f   :  { %s5189_s19 = scalar_lea.vmem %s28_s16, 256  ;;  %p5194_p6 = scmp.lt.s32.totalorder %s28_s16, %s28_s16 }
  0x30   :  { %p5190_p5 = scmp.ne.s32.totalorder %s28_s16, %s5189_s19  ;;  %p5195_p7 = scmp.lt.s32.totalorder %s5189_s19, %s5189_s19 }
  0x32   :  { %p5196_p8 = por %p5195_p7, %p5194_p6 }
  0x34   :  { %p5197_p9 = pnand %p5196_p8, %p5190_p5 }
  0x36   :  { %5200 = shalt.err (!%p5197_p9)
}
  0x37   :  { %33 = dma.hbm_to_vmem [thread:$0]  %s5809_s0, 256, %s28_s16, [#allocation4], %s5276_s28, %s5276_s28, %s5277_s29  }
  0x38   :  { %s5282_s21 = smov [#allocation7]   ;;  %s5283_s23 = smov [#allocation10]  }
  0x39   :  { %s53_s22 = sshll.u32 %s5282_s21, 4  ;;  %s79_s24 = sshll.u32 %s5283_s23, 4  ;;  %s54_s22 = int_to_ptr.vmem [resolvable:$true] %s53_s22  ;;  %s80_s24 = int_to_ptr.vmem [resolvable:$true] %s79_s24 }
  0x3a   :  { %s5201_s27 = scalar_lea.hbm %s5812_s3, 8192 }
  0x3b   :  { %p5202_p10 = scmp.ne.s32.totalorder %s5812_s3, %s5201_s27  ;;  %p5205_p11 = scmp.lt.u32.totalorder %s5201_s27, %s5812_s3 }
  0x3d   :  { %p5207_p12 = pnand %p5205_p11, %p5202_p10 }
  0x3f   :  { %5210 = shalt.err (!%p5207_p12)
}
  0x40   :  { %s5211_s0 = scalar_lea.vmem %s54_s22, 8192  ;;  %p5216_p0 = scmp.lt.s32.totalorder %s54_s22, %s54_s22 }
  0x41   :  { %p5212_p13 = scmp.ne.s32.totalorder %s54_s22, %s5211_s0  ;;  %p5217_p1 = scmp.lt.s32.totalorder %s5211_s0, %s5211_s0 }
  0x43   :  { %p5218_p2 = por %p5217_p1, %p5216_p0 }
  0x45   :  { %p5219_p3 = pnand %p5218_p2, %p5212_p13 }
  0x47   :  { %5222 = shalt.err (!%p5219_p3)
}
  0x48   :  { %59 = dma.hbm_to_vmem [thread:$0]  %s5812_s3, 8192, %s54_s22, [#allocation6], %s5280_s20, %s5280_s20, %s5281_s25  }
  0x49   :  { %s5223_s17 = scalar_lea.hbm %s5815_s6, 2048 }
  0x4a   :  { %p5224_p4 = scmp.ne.s32.totalorder %s5815_s6, %s5223_s17  ;;  %p5227_p5 = scmp.lt.u32.totalorder %s5223_s17, %s5815_s6 }
  0x4c   :  { %p5229_p6 = pnand %p5227_p5, %p5224_p4 }
  0x4e   :  { %5232 = shalt.err (!%p5229_p6)
}
  0x4f   :  { %s5233_s21 = scalar_lea.vmem %s80_s24, 2048  ;;  %p5238_p8 = scmp.lt.s32.totalorder %s80_s24, %s80_s24 }
  0x50   :  { %p5234_p7 = scmp.ne.s32.totalorder %s80_s24, %s5233_s21  ;;  %p5239_p9 = scmp.lt.s32.totalorder %s5233_s21, %s5233_s21 }
  0x52   :  { %p5240_p10 = por %p5239_p9, %p5238_p8 }
  0x54   :  { %p5241_p11 = pnand %p5240_p10, %p5234_p7 }
  0x56   :  { %5244 = shalt.err (!%p5241_p11)
}
  0x57   :  { %85 = dma.hbm_to_vmem [thread:$0]  %s5815_s6, 2048, %s80_s24, [#allocation9], %s5280_s20, %s5280_s20, %s5281_s25  }
  0x58   :  { %s5284_s23 = smov [#allocation11]   ;;  %s5245_s10 = scalar_lea.hbm %s5816_s7, 2048 }
  0x59   :  { %s91_s1 = sshll.u32 %s5284_s23, 4  ;;  %p5246_p12 = scmp.ne.s32.totalorder %s5816_s7, %s5245_s10  ;;  %s92_s1 = int_to_ptr.vmem [resolvable:$true] %s91_s1 }
  0x5a   :  { %p5249_p13 = scmp.lt.u32.totalorder %s5245_s10, %s5816_s7 }
  0x5c   :  { %p5251_p0 = pnand %p5249_p13, %p5246_p12 }
  0x5e   :  { %5254 = shalt.err (!%p5251_p0)
}
  0x5f   :  { %s5255_s28 = scalar_lea.vmem %s92_s1, 2048  ;;  %p5260_p2 = scmp.lt.s32.totalorder %s92_s1, %s92_s1 }
  0x60   :  { %p5256_p1 = scmp.ne.s32.totalorder %s92_s1, %s5255_s28  ;;  %p5261_p3 = scmp.lt.s32.totalorder %s5255_s28, %s5255_s28 }
  0x62   :  { %p5262_p4 = por %p5261_p3, %p5260_p2 }
  0x64   :  { %p5263_p5 = pnand %p5262_p4, %p5256_p1 }
  0x66   :  { %5266 = shalt.err (!%p5263_p5)
}
  0x67   :  { %97 = dma.hbm_to_vmem [thread:$0]  %s5816_s7, 2048, %s92_s1, [#allocation12], %s5280_s20, %s5280_s20, %s5281_s25  }
  0x68   :  { %5267 = dma.done.wait [#allocation4], 256  }
  0x69   :  { %5268 = vsyncadd [#allocation4], 4294967040 }
  0x6a   :  { %5269 = dma.done.wait [#allocation6], 9216  }
  0x6b   :  { %5270 = vsyncadd [#allocation6], 4294958080 }
  0x6c   :  { %5271 = dma.done.wait [#allocation9], 10240  }
  0x6d   :  { %5272 = vsyncadd [#allocation9], 4294957056 }
  0x6e   :  { %5273 = dma.done.wait [#allocation12], 2048  }
  0x6f   :  { %5274 = vsyncadd [#allocation12], 4294965248  ;;  %v5285_v1 = vmov 0.0   ;;  %v123_v2 = vld [vmem:[#allocation3] sm:$0xff]  ;;  %v124_v3 = vld [vmem:[#allocation3 + $0x8] sm:$0xff]  ;;  %vm5286_vm0 = vmmov 0  }
  0x70   :  { %4286 = vmatprep.subr.bf16.mxu0 %v5285_v1  ;;  %v134_v4 = vmul.f32 %v123_v2, %v123_v2  ;;  %v4886_v5 = vld [vmem:[#allocation7] sm:$0xff]   ;;  %v4887_v6 = vld [vmem:[#allocation7 + $0x8] sm:$0xff]   ;;  %v135_v7 = vmul.f32 %v124_v3, %v124_v3  ;;  %v4888_v8 = vld [vmem:[#allocation7 + $0x10] sm:$0xff]   ;;  %4302 = vmatprep.mubr.msk.bf16.mxu0 %vm5286_vm0, %v5285_v1  ;;  %vm335_vm1 = vcmask 130048   ;;  %vm3834_vm2 = vcmask 1041409  }
  0x71   :  { %4287 = vmatpush3.bf16.msra.mxu0 %v4886_v5  ;;  %v4889_v9 = vld [vmem:[#allocation7 + $0x18] sm:$0xff]   ;;  %v4890_v10 = vld [vmem:[#allocation7 + $0x20] sm:$0xff]   ;;  %v4891_v11 = vld [vmem:[#allocation7 + $0x28] sm:$0xff]   ;;  %vm3837_vm3 = vcmask 1041408   ;;  %vm3849_vm4 = vcmask 1024  }
  0x72   :  { %136 = vadd.xlane.f32.xlu0 %v134_v4  ;;  %4288 = vmatprep.subr.bf16.mxu0 %v5285_v1  ;;  %v4892_v12 = vld [vmem:[#allocation7 + $0x30] sm:$0xff]   ;;  %v4893_v13 = vld [vmem:[#allocation7 + $0x38] sm:$0xff]   ;;  %v3859_v23 = vld [vmem:[%s5811_s2] ss:$0 sm:$0xff] }
  0x73   :  { %v4894_v27 = vld [vmem:[#allocation7 + $0x40] sm:$0xff]   ;;  %v4895_v29 = vld [vmem:[#allocation7 + $0x48] sm:$0xff]   ;;  %v4896_v30 = vld [vmem:[#allocation7 + $0x50] sm:$0xff]  }
  0x74   :  { %v4897_v31 = vld [vmem:[#allocation7 + $0x58] sm:$0xff]   ;;  %v4898_v32 = vld [vmem:[#allocation7 + $0x60] sm:$0xff]   ;;  %v4899_v33 = vld [vmem:[#allocation7 + $0x68] sm:$0xff]  }
  0x75   :  { %4289 = vmatpush3.bf16.msra.mxu0 %v4887_v6  ;;  %v4900_v34 = vld [vmem:[#allocation7 + $0x70] sm:$0xff]   ;;  %v4901_v35 = vld [vmem:[#allocation7 + $0x78] sm:$0xff]   ;;  %v4902_v37 = vld [vmem:[#allocation8] sm:$0xff]  }
  0x76   :  { %138 = vadd.xlane.f32.xlu0 %v135_v7  ;;  %4290 = vmatprep.subr.bf16.mxu0 %v5285_v1  ;;  %v4903_v41 = vld [vmem:[#allocation8 + $0x8] sm:$0xff]   ;;  %v4904_v42 = vld [vmem:[#allocation8 + $0x10] sm:$0xff]   ;;  %v4905_v43 = vld [vmem:[#allocation8 + $0x18] sm:$0xff]  }
  0x77   :  { %v4906_v44 = vld [vmem:[#allocation8 + $0x20] sm:$0xff]   ;;  %v4907_v45 = vld [vmem:[#allocation8 + $0x28] sm:$0xff]   ;;  %v4908_v46 = vld [vmem:[#allocation8 + $0x30] sm:$0xff]  }
  0x78   :  { %v4909_v47 = vld [vmem:[#allocation8 + $0x38] sm:$0xff]   ;;  %v4910_v49 = vld [vmem:[#allocation8 + $0x40] sm:$0xff]   ;;  %v4911_v53 = vld [vmem:[#allocation8 + $0x48] sm:$0xff]  }
  0x79   :  { %4291 = vmatpush3.bf16.msra.mxu0 %v4888_v8  ;;  %v4912_v54 = vld [vmem:[#allocation8 + $0x50] sm:$0xff]   ;;  %v4913_v55 = vld [vmem:[#allocation8 + $0x58] sm:$0xff]   ;;  %v4914_v56 = vld [vmem:[#allocation8 + $0x60] sm:$0xff]  }
  0x7a   :  { %4292 = vmatprep.subr.bf16.mxu0 %v5285_v1  ;;  %v4915_v57 = vld [vmem:[#allocation8 + $0x68] sm:$0xff]   ;;  %v4916_v58 = vld [vmem:[#allocation8 + $0x70] sm:$0xff]   ;;  %v4917_v59 = vld [vmem:[#allocation8 + $0x78] sm:$0xff]  }
  0x7b   :  { %v125_v60 = vld [vmem:[#allocation5] sm:$0xff]  ;;  %v128_v5 = vld [vmem:[#allocation5 + $0x18] sm:$0xff] }
  0x7d   :  { %4293 = vmatpush3.bf16.msra.mxu0 %v4889_v9 }
  0x7e   :  { %4294 = vmatprep.subr.bf16.mxu0 %v5285_v1 }
  0x81   :  { %4295 = vmatpush3.bf16.msra.mxu0 %v4890_v10 }
  0x82   :  { %4296 = vmatprep.subr.bf16.mxu0 %v5285_v1 }
  0x85   :  { %4297 = vmatpush3.bf16.msra.mxu0 %v4891_v11 }
  0x86   :  { %4298 = vmatprep.subr.bf16.mxu0 %v5285_v1 }
  0x89   :  { %4299 = vmatpush3.bf16.msra.mxu0 %v4892_v12 }
  0x8a   :  { %4300 = vmatprep.subr.bf16.mxu0 %v5285_v1 }
  0x8d   :  { %4301 = vmatpush3.bf16.msra.mxu0 %v4893_v13 }
  0x8e   :  { %4333 = vmatprep.subr.bf16.mxu0 %v5285_v1 }
  0xff   :  { %v137_v14 = vpop.xlane.xlu0 %136 }
 0x100   :  { %v140_v15 = vmul.f32 0.03125, %v137_v14  ;;  %v5500_v14 = vld [vmem:[#allocation5 + $0x8] sm:$0xff] }
 0x102   :  { %v142_v16 = vadd.f32 1e-06, %v140_v15 }
 0x103   :  { %v139_v17 = vpop.xlane.xlu0 %138 }
 0x104   :  { %5046 = vrsqrt.f32 %v142_v16  ;;  %v141_v18 = vmul.f32 0.03125, %v139_v17 }
 0x106   :  { %v143_v19 = vadd.f32 1e-06, %v141_v18 }
 0x108   :  { %5048 = vrsqrt.f32 %v143_v19 }
 0x10e   :  { %v5047_v20 = vpop.eup %5046 }
 0x10f   :  { %v146_v21 = vmul.f32 %v5047_v20, %v123_v2  ;;  %v127_v2 = vld [vmem:[#allocation5 + $0x10] sm:$0xff] }
 0x111   :  { %v152_v25 = vmul.f32 %v3859_v23, %v146_v21 }
 0x112   :  { %v5049_v22 = vpop.eup %5048 }
 0x113   :  { %v147_v24 = vmul.f32 %v5049_v22, %v124_v3 }
 0x115   :  { %v153_v26 = vmul.f32 %v3859_v23, %v147_v24 }
 0x117   :  { %v5454_v28 = vpack.c.bf16 %v153_v26, %v152_v25 }
 0x119   :  { %4303 = vmatmul.mubr.bf16.vlgmr.msra.gmra.mrb[0].mxu0 %v5454_v28  ;;  %4799 = vmatprep.subr.bf16.mxu1 %v5454_v28 }
 0x11a   :  { %4334 = vmatpush3.bf16.msra.mxu0 %v4894_v27  ;;  %4801 = vmatpush3.bf16.xpose.msra.mxu1 %v5454_v28 }
 0x11b   :  { %4335 = vmatprep.subr.bf16.mxu0 %v5285_v1  ;;  %4349 = vmatprep.mubr.msk.bf16.mxu0 %vm5286_vm0, %v5285_v1 }
 0x11c   :  { %4313 = vmatprep.subr.bf16.mxu1 %v5285_v1 }
 0x11e   :  { %4336 = vmatpush3.bf16.msra.mxu0 %v4895_v29 }
 0x11f   :  { %4337 = vmatprep.subr.bf16.mxu0 %v5285_v1 }
 0x122   :  { %4338 = vmatpush3.bf16.msra.mxu0 %v4896_v30 }
 0x123   :  { %4339 = vmatprep.subr.bf16.mxu0 %v5285_v1 }
 0x126   :  { %4340 = vmatpush3.bf16.msra.mxu0 %v4897_v31 }
 0x127   :  { %4341 = vmatprep.subr.bf16.mxu0 %v5285_v1 }
 0x12a   :  { %4342 = vmatpush3.bf16.msra.mxu0 %v4898_v32 }
 0x12b   :  { %4343 = vmatprep.subr.bf16.mxu0 %v5285_v1 }
 0x12e   :  { %4344 = vmatpush3.bf16.msra.mxu0 %v4899_v33 }
 0x12f   :  { %4345 = vmatprep.subr.bf16.mxu0 %v5285_v1 }
 0x132   :  { %4346 = vmatpush3.bf16.msra.mxu0 %v4900_v34 }
 0x133   :  { %4347 = vmatprep.subr.bf16.mxu0 %v5285_v1 }
 0x136   :  { %4348 = vmatpush3.bf16.msra.mxu0 %v4901_v35 }
 0x137   :  { %4803 = vmatprep.subr.bf16.mxu0 %v5454_v28 }
 0x139   :  { %4350 = vmatmul.mubr.bf16.vlgmr.msra.gmra.mrb[4].mxu0 %v5454_v28 }
 0x13f   :  { %4805 = vmatpush3.bf16.xpose.msra.mxu0 %v5454_v28 }
 0x1ec   :  { %v253_v36 = vpop.f32.mrb[0].mxu0 }
 0x1ed   :  { %v4304_v38 = vpop.f32.mrb[1].mxu0  ;;  %4310 = vmatprep.mubr.f32.mxu1 %v253_v36 }
 0x1ee   :  { %v256_v39 = vpop.f32.mrb[2].mxu0 }
 0x1ef   :  { %v4305_v40 = vpop.f32.mrb[3].mxu0  ;;  %4311 = vmatmul.mubr.f32.vlgmr.msra.gmra.mrb[0].mxu1 %v256_v39 }
 0x1f0   :  { %4314 = vmatpush3.bf16.msra.mxu1 %v4902_v37  ;;  %4329 = vmatprep.mubr.msk.bf16.mxu1 %vm5286_vm0, %v5285_v1 }
 0x1f1   :  { %4315 = vmatprep.subr.bf16.mxu1 %v5285_v1 }
 0x1f4   :  { %4316 = vmatpush3.bf16.msra.mxu1 %v4903_v41 }
 0x1f5   :  { %4317 = vmatprep.subr.bf16.mxu1 %v5285_v1 }
 0x1f8   :  { %4318 = vmatpush3.bf16.msra.mxu1 %v4904_v42 }
 0x1f9   :  { %4319 = vmatprep.subr.bf16.mxu1 %v5285_v1 }
 0x1fc   :  { %4320 = vmatpush3.bf16.msra.mxu1 %v4905_v43 }
 0x1fd   :  { %4321 = vmatprep.subr.bf16.mxu1 %v5285_v1 }
 0x200   :  { %4322 = vmatpush3.bf16.msra.mxu1 %v4906_v44 }
 0x201   :  { %4323 = vmatprep.subr.bf16.mxu1 %v5285_v1 }
 0x204   :  { %4324 = vmatpush3.bf16.msra.mxu1 %v4907_v45 }
 0x205   :  { %4325 = vmatprep.subr.bf16.mxu1 %v5285_v1 }
 0x208   :  { %4326 = vmatpush3.bf16.msra.mxu1 %v4908_v46 }
 0x209   :  { %4327 = vmatprep.subr.bf16.mxu1 %v5285_v1 }
 0x20c   :  { %4328 = vmatpush3.bf16.msra.mxu1 %v4909_v47  ;;  %v562_v48 = vpop.f32.mrb[4].mxu0 }
 0x20d   :  { %v4351_v50 = vpop.f32.mrb[5].mxu0  ;;  %4357 = vmatprep.mubr.f32.mxu0 %v562_v48  ;;  %4360 = vmatprep.subr.bf16.mxu1 %v5285_v1 }
 0x20e   :  { %v565_v51 = vpop.f32.mrb[6].mxu0 }
 0x20f   :  { %4330 = vmatmul.mubr.bf16.vlgmr.msra.gmra.mrb[4].mxu1 %v5454_v28  ;;  %v4352_v52 = vpop.f32.mrb[7].mxu0  ;;  %4358 = vmatmul.mubr.f32.vlgmr.msra.gmra.mrb[8].mxu0 %v565_v51 }
 0x210   :  { %4361 = vmatpush3.bf16.msra.mxu1 %v4910_v49  ;;  %4376 = vmatprep.mubr.msk.bf16.mxu1 %vm5286_vm0, %v5285_v1 }
 0x211   :  { %4362 = vmatprep.subr.bf16.mxu1 %v5285_v1 }
 0x214   :  { %4363 = vmatpush3.bf16.msra.mxu1 %v4911_v53 }
 0x215   :  { %4364 = vmatprep.subr.bf16.mxu1 %v5285_v1 }
 0x218   :  { %4365 = vmatpush3.bf16.msra.mxu1 %v4912_v54 }
 0x219   :  { %4366 = vmatprep.subr.bf16.mxu1 %v5285_v1 }
 0x21c   :  { %4367 = vmatpush3.bf16.msra.mxu1 %v4913_v55  ;;  %v4918_v55 = vld [vmem:[#allocation7 + $0x80] sm:$0xff]  }
 0x21d   :  { %4368 = vmatprep.subr.bf16.mxu1 %v5285_v1 }
 0x220   :  { %4369 = vmatpush3.bf16.msra.mxu1 %v4914_v56 }
 0x221   :  { %4370 = vmatprep.subr.bf16.mxu1 %v5285_v1 }
 0x224   :  { %4371 = vmatpush3.bf16.msra.mxu1 %v4915_v57  ;;  %v4919_v57 = vld [vmem:[#allocation7 + $0x88] sm:$0xff]  }
 0x225   :  { %4372 = vmatprep.subr.bf16.mxu1 %v5285_v1 }
 0x228   :  { %4373 = vmatpush3.bf16.msra.mxu1 %v4916_v58  ;;  %v4920_v58 = vld [vmem:[#allocation7 + $0x90] sm:$0xff]  }
 0x229   :  { %4374 = vmatprep.subr.bf16.mxu1 %v5285_v1 }
 0x22c   :  { %4375 = vmatpush3.bf16.msra.mxu1 %v4917_v59  ;;  %v4921_v59 = vld [vmem:[#allocation7 + $0x98] sm:$0xff]  }
 0x22d   :  { %4815 = vmatprep.subr.bf16.mxu1 %v5454_v28 }
 0x22f   :  { %4377 = vmatmul.mubr.bf16.vlgmr.msra.gmra.mrb[8].mxu1 %v5454_v28 }
 0x235   :  { %4817 = vmatpush3.bf16.xpose.msra.mxu1 %v5454_v28 }
 0x236   :  { %4421 = vmatprep.subr.bf16.mxu1 %v5285_v1 }
 0x2c2   :  { %v4312_v61 = vpop.f32.mrb[0].mxu1 }
 0x2c3   :  { %v326_v62 = vpop.f32.mrb[1].mxu1  ;;  %v332_v15 = vadd.f32 %v4312_v61, %v5500_v14  ;;  %v4923_v61 = vld [vmem:[#allocation7 + $0xa8] sm:$0xff]  }
 0x2c4   :  { %v327_v63 = vadd.f32 %v326_v62, %v125_v60  ;;  %v4922_v60 = vld [vmem:[#allocation7 + $0xa0] sm:$0xff]   ;;  %v4924_v62 = vld [vmem:[#allocation7 + $0xb0] sm:$0xff]  }
 0x2c5   :  { %v339_v17 = vsel %vm335_vm1, %v332_v15, -inf }
 0x2c6   :  { %v336_v0 = vsel %vm335_vm1, %v327_v63, -inf }
 0x2c7   :  { %337 = vmax.xlane.f32.xlu0 %v336_v0 }
 0x2e2   :  { %v456_v3 = vpop.f32.mrb[4].mxu1  ;;  %v4359_v4 = vpop.f32.mrb[8].mxu0 }
 0x2e3   :  { %v4331_v6 = vpop.f32.mrb[5].mxu1  ;;  %v635_v7 = vpop.f32.mrb[9].mxu0  ;;  %v641_v12 = vadd.f32 %v4359_v4, %v128_v5 }
 0x2e4   :  { %v636_v8 = vadd.f32 %v635_v7, %v127_v2  ;;  %v459_v9 = vpop.f32.mrb[6].mxu1  ;;  %v4926_v2 = vld [vmem:[#allocation8 + $0x80] sm:$0xff]   ;;  %v4927_v6 = vld [vmem:[#allocation8 + $0x88] sm:$0xff]   ;;  %v4928_v7 = vld [vmem:[#allocation8 + $0x90] sm:$0xff]  }
 0x2e5   :  { %v5497_v10 = vpack.c.bf16 %v459_v9, %v456_v3  ;;  %v4332_v11 = vpop.f32.mrb[7].mxu1  ;;  %v647_v16 = vsel %vm335_vm1, %v641_v12, -inf  ;;  %v4930_v9 = vld [vmem:[#allocation8 + $0xa0] sm:$0xff]  }
 0x2e6   :  { %v644_v13 = vsel %vm335_vm1, %v636_v8, -inf  ;;  %v4932_v11 = vld [vmem:[#allocation8 + $0xb0] sm:$0xff]  }
 0x2e7   :  { %645 = vmax.xlane.f32.xlu1 %v644_v13  ;;  %v5539_v13 = vld [vmem:[#allocation5 + $0x28] sm:$0xff] }
 0x2eb   :  { %648 = vmax.xlane.f32.xlu1 %v647_v16 }
 0x2ef   :  { %340 = vmax.xlane.f32.xlu1 %v339_v17 }
 0x302   :  { %v765_v18 = vpop.f32.mrb[8].mxu1 }
 0x303   :  { %v4378_v19 = vpop.f32.mrb[9].mxu1 }
 0x304   :  { %v768_v20 = vpop.f32.mrb[10].mxu1 }
 0x305   :  { %v4806_v21 = vpack.c.bf16 %v768_v20, %v765_v18  ;;  %v4379_v22 = vpop.f32.mrb[11].mxu1 }
 0x307   :  { %4807 = vmatprep.subr.bf16.mxu0 %v4806_v21 }
 0x308   :  { %4809 = vmatpush3.bf16.msra.mxu0 %v4806_v21 }
 0x309   :  { %4811 = vmatprep.subr.bf16.mxu0 %v5497_v10 }
 0x354   :  { %v338_v23 = vpop.xlane.xlu0 %337 }
 0x355   :  { %v342_v24 = vsub.f32 %v327_v63, %v338_v23  ;;  %v4925_v63 = vld [vmem:[#allocation7 + $0xb8] sm:$0xff]  }
 0x357   :  { %v344_v27 = vmul.f32 1.442695, %v342_v24 }
 0x374   :  { %v646_v25 = vpop.xlane.xlu1 %645 }
 0x375   :  { %v650_v26 = vsub.f32 %v636_v8, %v646_v25  ;;  %v4929_v8 = vld [vmem:[#allocation8 + $0x98] sm:$0xff]  }
 0x377   :  { %v652_v29 = vmul.f32 1.442695, %v650_v26 }
 0x378   :  { %v649_v30 = vpop.xlane.xlu1 %648 }
 0x379   :  { %5050 = vpow2.f32 %v652_v29  ;;  %v651_v31 = vsub.f32 %v641_v12, %v649_v30  ;;  %v4933_v12 = vld [vmem:[#allocation8 + $0xb8] sm:$0xff]  }
 0x37a   :  { %5052 = vpow2.f32 %v344_v27 }
 0x37b   :  { %v654_v32 = vmul.f32 1.442695, %v651_v31 }
 0x37c   :  { %v341_v33 = vpop.xlane.xlu1 %340 }
 0x37d   :  { %5054 = vpow2.f32 %v654_v32  ;;  %v343_v34 = vsub.f32 %v332_v15, %v341_v33  ;;  %v5541_v15 = vld [vmem:[#allocation5 + $0x20] sm:$0xff] }
 0x37f   :  { %v346_v35 = vmul.f32 1.442695, %v343_v34 }
 0x381   :  { %5056 = vpow2.f32 %v346_v35 }
 0x383   :  { %v5051_v36 = vpop.eup %5050 }
 0x384   :  { %v656_v37 = vsel %vm335_vm1, %v5051_v36, 0.0  ;;  %v5053_v38 = vpop.eup %5052 }
 0x385   :  { %657 = vadd.xlane.f32.xlu0 %v656_v37  ;;  %v348_v40 = vsel %vm335_vm1, %v5053_v38, 0.0 }
 0x387   :  { %v5055_v39 = vpop.eup %5054 }
 0x388   :  { %v659_v41 = vsel %vm335_vm1, %v5055_v39, 0.0 }
 0x389   :  { %349 = vadd.xlane.f32.xlu0 %v348_v40  ;;  %660 = vadd.xlane.f32.xlu1 %v659_v41 }
 0x38b   :  { %v5057_v42 = vpop.eup %5056 }
 0x38c   :  { %v351_v43 = vsel %vm335_vm1, %v5057_v42, 0.0 }
 0x38d   :  { %352 = vadd.xlane.f32.xlu1 %v351_v43  ;;  %v4934_v43 = vld [vmem:[#allocation7 + $0xc0] sm:$0xff]  }
 0x412   :  { %v658_v44 = vpop.xlane.xlu0 %657 }
 0x413   :  { %5058 = vrcp.f32 %v658_v44 }
 0x416   :  { %v350_v45 = vpop.xlane.xlu0 %349  ;;  %v661_v46 = vpop.xlane.xlu1 %660 }
 0x417   :  { %5060 = vrcp.f32 %v350_v45  ;;  %v4935_v45 = vld [vmem:[#allocation7 + $0xc8] sm:$0xff]  }
 0x418   :  { %5062 = vrcp.f32 %v661_v46  ;;  %v4936_v46 = vld [vmem:[#allocation7 + $0xd0] sm:$0xff]  }
 0x41a   :  { %v353_v47 = vpop.xlane.xlu1 %352 }
 0x41b   :  { %5064 = vrcp.f32 %v353_v47  ;;  %v4937_v47 = vld [vmem:[#allocation7 + $0xd8] sm:$0xff]  }
 0x41d   :  { %v5059_v48 = vpop.eup %5058 }
 0x41e   :  { %v664_v49 = vmul.f32 %v5059_v48, %v5051_v36  ;;  %v4938_v48 = vld [vmem:[#allocation7 + $0xe0] sm:$0xff]  }
 0x420   :  { %4384 = vmatprep.mubr.msk.f32.mxu0 %vm335_vm1, %v664_v49  ;;  %v4939_v49 = vld [vmem:[#allocation7 + $0xe8] sm:$0xff]  }
 0x421   :  { %v5061_v50 = vpop.eup %5060 }
 0x422   :  { %v5063_v51 = vpop.eup %5062  ;;  %v356_v52 = vmul.f32 %v5061_v50, %v5053_v38  ;;  %v4940_v50 = vld [vmem:[#allocation7 + $0xf0] sm:$0xff]  }
 0x423   :  { %v665_v53 = vmul.f32 %v5063_v51, %v5055_v39  ;;  %v4941_v51 = vld [vmem:[#allocation7 + $0xf8] sm:$0xff]  }
 0x425   :  { %4385 = vmatmul.mubr.msk.f32.vlgmr.msra.gmra.mrb[10].mxu0 %vm335_vm1, %v665_v53  ;;  %v5065_v54 = vpop.eup %5064  ;;  %v4942_v53 = vld [vmem:[#allocation8 + $0xc0] sm:$0xff]  }
 0x426   :  { %4813 = vmatpush3.bf16.msra.mxu0 %v5497_v10  ;;  %4391 = vmatprep.mubr.msk.f32.mxu0 %vm335_vm1, %v356_v52  ;;  %v357_v56 = vmul.f32 %v5065_v54, %v5057_v42  ;;  %v4931_v10 = vld [vmem:[#allocation8 + $0xa8] sm:$0xff]  }
 0x427   :  { %4394 = vmatprep.subr.bf16.mxu0 %v5285_v1 }
 0x42d   :  { %4392 = vmatmul.mubr.msk.f32.vlgmr.msra.gmra.mrb[10].mxu0 %vm335_vm1, %v357_v56 }
 0x42e   :  { %4395 = vmatpush3.bf16.msra.mxu0 %v4918_v55  ;;  %4410 = vmatprep.mubr.msk.bf16.mxu0 %vm5286_vm0, %v5285_v1 }
 0x42f   :  { %4396 = vmatprep.subr.bf16.mxu0 %v5285_v1 }
 0x432   :  { %4397 = vmatpush3.bf16.msra.mxu0 %v4919_v57  ;;  %v4943_v57 = vld [vmem:[#allocation8 + $0xc8] sm:$0xff]  }
 0x433   :  { %4398 = vmatprep.subr.bf16.mxu0 %v5285_v1 }
 0x436   :  { %4399 = vmatpush3.bf16.msra.mxu0 %v4920_v58  ;;  %v4944_v58 = vld [vmem:[#allocation8 + $0xd0] sm:$0xff]  }
 0x437   :  { %4400 = vmatprep.subr.bf16.mxu0 %v5285_v1 }
 0x43a   :  { %4401 = vmatpush3.bf16.msra.mxu0 %v4921_v59  ;;  %v4945_v59 = vld [vmem:[#allocation8 + $0xd8] sm:$0xff]  }
 0x43b   :  { %4402 = vmatprep.subr.bf16.mxu0 %v5285_v1 }
 0x43e   :  { %4403 = vmatpush3.bf16.msra.mxu0 %v4922_v60  ;;  %v4946_v60 = vld [vmem:[#allocation8 + $0xe0] sm:$0xff]  }
 0x43f   :  { %4404 = vmatprep.subr.bf16.mxu0 %v5285_v1 }
 0x442   :  { %4405 = vmatpush3.bf16.msra.mxu0 %v4923_v61  ;;  %v4947_v61 = vld [vmem:[#allocation8 + $0xe8] sm:$0xff]  }
 0x443   :  { %4406 = vmatprep.subr.bf16.mxu0 %v5285_v1 }
 0x446   :  { %4407 = vmatpush3.bf16.msra.mxu0 %v4924_v62  ;;  %v4948_v62 = vld [vmem:[#allocation8 + $0xf0] sm:$0xff]  }
 0x447   :  { %4408 = vmatprep.subr.bf16.mxu0 %v5285_v1 }
 0x44a   :  { %4409 = vmatpush3.bf16.msra.mxu0 %v4925_v63  ;;  %v4949_v63 = vld [vmem:[#allocation8 + $0xf8] sm:$0xff]  }
 0x44d   :  { %4411 = vmatmul.mubr.bf16.vlgmr.msra.gmra.mrb[12].mxu0 %v5454_v28 }
 0x520   :  { %v1033_v0 = vpop.f32.mrb[12].mxu0 }
 0x521   :  { %v4412_v3 = vpop.f32.mrb[13].mxu0  ;;  %4418 = vmatprep.mubr.f32.mxu1 %v1033_v0  ;;  %v5575_v0 = vld [vmem:[#allocation5 + $0x38] sm:$0xff] }
 0x522   :  { %v1036_v4 = vpop.f32.mrb[14].mxu0 }
 0x523   :  { %v4413_v5 = vpop.f32.mrb[15].mxu0  ;;  %4419 = vmatmul.mubr.f32.vlgmr.msra.gmra.mrb[2].mxu1 %v1036_v4 }
 0x524   :  { %4422 = vmatpush3.bf16.msra.mxu1 %v4926_v2  ;;  %4437 = vmatprep.mubr.msk.bf16.mxu1 %vm5286_vm0, %v5285_v1  ;;  %v5577_v2 = vld [vmem:[#allocation5 + $0x30] sm:$0xff] }
 0x525   :  { %4423 = vmatprep.subr.bf16.mxu1 %v5285_v1 }
 0x528   :  { %4424 = vmatpush3.bf16.msra.mxu1 %v4927_v6 }
 0x529   :  { %4425 = vmatprep.subr.bf16.mxu1 %v5285_v1 }
 0x52c   :  { %4426 = vmatpush3.bf16.msra.mxu1 %v4928_v7 }
 0x52d   :  { %4427 = vmatprep.subr.bf16.mxu1 %v5285_v1 }
 0x530   :  { %4428 = vmatpush3.bf16.msra.mxu1 %v4929_v8 }
 0x531   :  { %4429 = vmatprep.subr.bf16.mxu1 %v5285_v1 }
 0x534   :  { %4430 = vmatpush3.bf16.msra.mxu1 %v4930_v9 }
 0x535   :  { %4431 = vmatprep.subr.bf16.mxu1 %v5285_v1 }
 0x538   :  { %4432 = vmatpush3.bf16.msra.mxu1 %v4931_v10 }
 0x539   :  { %4433 = vmatprep.subr.bf16.mxu1 %v5285_v1 }
 0x53c   :  { %4434 = vmatpush3.bf16.msra.mxu1 %v4932_v11 }
 0x53d   :  { %4435 = vmatprep.subr.bf16.mxu1 %v5285_v1 }
 0x540   :  { %4436 = vmatpush3.bf16.msra.mxu1 %v4933_v12 }
 0x541   :  { %4823 = vmatprep.subr.bf16.mxu1 %v5454_v28 }
 0x543   :  { %4438 = vmatmul.mubr.bf16.vlgmr.msra.gmra.mrb[12].mxu1 %v5454_v28 }
 0x549   :  { %4825 = vmatpush3.bf16.xpose.msra.mxu1 %v5454_v28 }
 0x54a   :  { %4475 = vmatprep.subr.bf16.mxu1 %v5285_v1 }
 0x5f6   :  { %v4420_v16 = vpop.f32.mrb[2].mxu1 }
 0x5f7   :  { %v1112_v17 = vadd.f32 %v4420_v16, %v5539_v13  ;;  %v1106_v18 = vpop.f32.mrb[3].mxu1 }
 0x5f8   :  { %v1107_v19 = vadd.f32 %v1106_v18, %v5541_v15 }
 0x5f9   :  { %v1118_v20 = vsel %vm335_vm1, %v1112_v17, -inf }
 0x5fa   :  { %1119 = vmax.xlane.f32.xlu1 %v1118_v20  ;;  %v1115_v21 = vsel %vm335_vm1, %v1107_v19, -inf }
 0x5fb   :  { %1116 = vmax.xlane.f32.xlu0 %v1115_v21 }
 0x616   :  { %v1236_v22 = vpop.f32.mrb[12].mxu1 }
 0x617   :  { %v4439_v23 = vpop.f32.mrb[13].mxu1 }
 0x618   :  { %v1239_v24 = vpop.f32.mrb[14].mxu1 }
 0x619   :  { %v4818_v25 = vpack.c.bf16 %v1239_v24, %v1236_v22  ;;  %v4440_v26 = vpop.f32.mrb[15].mxu1 }
 0x61b   :  { %4819 = vmatprep.subr.bf16.mxu0 %v4818_v25 }
 0x61c   :  { %4821 = vmatpush3.bf16.msra.mxu0 %v4818_v25 }
 0x61d   :  { %4448 = vmatprep.subr.bf16.mxu0 %v5285_v1 }
 0x687   :  { %v1120_v27 = vpop.xlane.xlu1 %1119 }
 0x688   :  { %v1122_v29 = vsub.f32 %v1112_v17, %v1120_v27  ;;  %v1117_v30 = vpop.xlane.xlu0 %1116 }
 0x689   :  { %v1121_v31 = vsub.f32 %v1107_v19, %v1117_v30 }
 0x68a   :  { %v1125_v32 = vmul.f32 1.442695, %v1122_v29 }
 0x68b   :  { %v1123_v33 = vmul.f32 1.442695, %v1121_v31 }
 0x68c   :  { %5066 = vpow2.f32 %v1125_v32 }
 0x68d   :  { %5068 = vpow2.f32 %v1123_v33  ;;  %v4950_v33 = vld [vmem:[#allocation10] sm:$0xff]  }
 0x696   :  { %v5067_v34 = vpop.eup %5066 }
 0x697   :  { %v5069_v35 = vpop.eup %5068  ;;  %v1130_v36 = vsel %vm335_vm1, %v5067_v34, 0.0 }
 0x698   :  { %1131 = vadd.xlane.f32.xlu1 %v1130_v36  ;;  %v1127_v37 = vsel %vm335_vm1, %v5069_v35, 0.0 }
 0x699   :  { %1128 = vadd.xlane.f32.xlu0 %v1127_v37  ;;  %v5130_v37 = vld [vmem:[#allocation3 + $0x8] sm:$0xff] }
 0x725   :  { %v1132_v38 = vpop.xlane.xlu1 %1131 }
 0x726   :  { %5070 = vrcp.f32 %v1132_v38  ;;  %v1129_v39 = vpop.xlane.xlu0 %1128 }
 0x727   :  { %5072 = vrcp.f32 %v1129_v39 }
 0x730   :  { %v5071_v40 = vpop.eup %5070 }
 0x731   :  { %v5073_v41 = vpop.eup %5072  ;;  %v1136_v44 = vmul.f32 %v5071_v40, %v5067_v34  ;;  %v4951_v34 = vld [vmem:[#allocation10 + $0x8] sm:$0xff]   ;;  %v5131_v40 = vld [vmem:[#allocation3] sm:$0xff] }
 0x732   :  { %v1135_v42 = vmul.f32 %v5073_v41, %v5069_v35  ;;  %v4952_v35 = vld [vmem:[#allocation10 + $0x10] sm:$0xff]  }
 0x734   :  { %4445 = vmatprep.mubr.msk.f32.mxu0 %vm335_vm1, %v1135_v42 }
 0x735   :  { %4446 = vmatmul.mubr.msk.f32.vlgmr.msra.gmra.mrb[10].mxu0 %vm335_vm1, %v1136_v44  ;;  %v4953_v44 = vld [vmem:[#allocation10 + $0x18] sm:$0xff]  }
 0x736   :  { %4449 = vmatpush3.bf16.msra.mxu0 %v4934_v43  ;;  %4464 = vmatprep.mubr.msk.bf16.mxu0 %vm5286_vm0, %v5285_v1 }
 0x737   :  { %4450 = vmatprep.subr.bf16.mxu0 %v5285_v1 }
 0x73a   :  { %4451 = vmatpush3.bf16.msra.mxu0 %v4935_v45  ;;  %v4954_v45 = vld [vmem:[#allocation10 + $0x20] sm:$0xff]  }
 0x73b   :  { %4452 = vmatprep.subr.bf16.mxu0 %v5285_v1 }
 0x73e   :  { %4453 = vmatpush3.bf16.msra.mxu0 %v4936_v46  ;;  %v4955_v46 = vld [vmem:[#allocation10 + $0x28] sm:$0xff]  }
 0x73f   :  { %4454 = vmatprep.subr.bf16.mxu0 %v5285_v1 }
 0x742   :  { %4455 = vmatpush3.bf16.msra.mxu0 %v4937_v47  ;;  %v4956_v47 = vld [vmem:[#allocation10 + $0x30] sm:$0xff]  }
 0x743   :  { %4456 = vmatprep.subr.bf16.mxu0 %v5285_v1 }
 0x746   :  { %4457 = vmatpush3.bf16.msra.mxu0 %v4938_v48  ;;  %v4957_v48 = vld [vmem:[#allocation10 + $0x38] sm:$0xff]  }
 0x747   :  { %4458 = vmatprep.subr.bf16.mxu0 %v5285_v1 }
 0x74a   :  { %4459 = vmatpush3.bf16.msra.mxu0 %v4939_v49  ;;  %v4958_v49 = vld [vmem:[#allocation11] sm:$0xff]  }
 0x74b   :  { %4460 = vmatprep.subr.bf16.mxu0 %v5285_v1 }
 0x74e   :  { %4461 = vmatpush3.bf16.msra.mxu0 %v4940_v50  ;;  %v4959_v50 = vld [vmem:[#allocation11 + $0x8] sm:$0xff]  }
 0x74f   :  { %4462 = vmatprep.subr.bf16.mxu0 %v5285_v1 }
 0x752   :  { %4463 = vmatpush3.bf16.msra.mxu0 %v4941_v51  ;;  %v4960_v51 = vld [vmem:[#allocation11 + $0x10] sm:$0xff]  }
 0x755   :  { %4465 = vmatmul.mubr.bf16.vlgmr.msra.gmra.mrb[16].mxu0 %v5454_v28 }
 0x828   :  { %v1425_v52 = vpop.f32.mrb[16].mxu0 }
 0x829   :  { %v4466_v54 = vpop.f32.mrb[17].mxu0  ;;  %4472 = vmatprep.mubr.f32.mxu1 %v1425_v52  ;;  %v4961_v52 = vld [vmem:[#allocation11 + $0x18] sm:$0xff]  }
 0x82a   :  { %v1428_v55 = vpop.f32.mrb[18].mxu0  ;;  %v4963_v54 = vld [vmem:[#allocation11 + $0x28] sm:$0xff]  }
 0x82b   :  { %v4467_v56 = vpop.f32.mrb[19].mxu0  ;;  %4473 = vmatmul.mubr.f32.vlgmr.msra.gmra.mrb[16].mxu1 %v1428_v55 }
 0x82c   :  { %4476 = vmatpush3.bf16.msra.mxu1 %v4942_v53  ;;  %4491 = vmatprep.mubr.msk.bf16.mxu1 %vm5286_vm0, %v5285_v1  ;;  %v4962_v53 = vld [vmem:[#allocation11 + $0x20] sm:$0xff]  }
 0x82d   :  { %4477 = vmatprep.subr.bf16.mxu1 %v5285_v1 }
 0x830   :  { %4478 = vmatpush3.bf16.msra.mxu1 %v4943_v57 }
 0x831   :  { %4479 = vmatprep.subr.bf16.mxu1 %v5285_v1 }
 0x834   :  { %4480 = vmatpush3.bf16.msra.mxu1 %v4944_v58 }
 0x835   :  { %4481 = vmatprep.subr.bf16.mxu1 %v5285_v1 }
 0x838   :  { %4482 = vmatpush3.bf16.msra.mxu1 %v4945_v59 }
 0x839   :  { %4483 = vmatprep.subr.bf16.mxu1 %v5285_v1 }
 0x83c   :  { %4484 = vmatpush3.bf16.msra.mxu1 %v4946_v60 }
 0x83d   :  { %4485 = vmatprep.subr.bf16.mxu1 %v5285_v1 }
 0x840   :  { %4486 = vmatpush3.bf16.msra.mxu1 %v4947_v61 }
 0x841   :  { %4487 = vmatprep.subr.bf16.mxu1 %v5285_v1 }
 0x844   :  { %4488 = vmatpush3.bf16.msra.mxu1 %v4948_v62  ;;  %v3932_v62 = vld [vmem:[%s5814_s5] ss:$0 sm:$0xff] }
 0x845   :  { %4489 = vmatprep.subr.bf16.mxu1 %v5285_v1 }
 0x848   :  { %4490 = vmatpush3.bf16.msra.mxu1 %v4949_v63 }
 0x849   :  { %4522 = vmatprep.subr.bf16.mxu1 %v5285_v1 }
 0x84b   :  { %4492 = vmatmul.mubr.bf16.vlgmr.msra.gmra.mrb[20].mxu1 %v5454_v28 }
 0x84c   :  { %4538 = vmatprep.mubr.msk.bf16.mxu1 %vm5286_vm0, %v5285_v1  ;;  %4523 = vmatpush3.bf16.msra.mxu1 %v4958_v49  ;;  %v4974_v49 = vld [vmem:[#allocation7 + $0x140] sm:$0xff]  }
 0x84d   :  { %4524 = vmatprep.subr.bf16.mxu1 %v5285_v1 }
 0x850   :  { %4525 = vmatpush3.bf16.msra.mxu1 %v4959_v50 }
 0x851   :  { %4526 = vmatprep.subr.bf16.mxu1 %v5285_v1 }
 0x854   :  { %4527 = vmatpush3.bf16.msra.mxu1 %v4960_v51  ;;  %v4975_v51 = vld [vmem:[#allocation7 + $0x148] sm:$0xff]  }
 0x855   :  { %4528 = vmatprep.subr.bf16.mxu1 %v5285_v1 }
 0x858   :  { %4529 = vmatpush3.bf16.msra.mxu1 %v4961_v52  ;;  %v4976_v52 = vld [vmem:[#allocation7 + $0x150] sm:$0xff]  }
 0x859   :  { %4530 = vmatprep.subr.bf16.mxu1 %v5285_v1 }
 0x85c   :  { %4531 = vmatpush3.bf16.msra.mxu1 %v4962_v53  ;;  %v4977_v53 = vld [vmem:[#allocation7 + $0x158] sm:$0xff]  }
 0x85d   :  { %4532 = vmatprep.subr.bf16.mxu1 %v5285_v1 }
 0x860   :  { %4533 = vmatpush3.bf16.msra.mxu1 %v4963_v54  ;;  %v4978_v54 = vld [vmem:[#allocation7 + $0x160] sm:$0xff]  }
 0x861   :  { %4534 = vmatprep.subr.bf16.mxu1 %v5285_v1 }
 0x8fe   :  { %v4474_v3 = vpop.f32.mrb[16].mxu1 }
 0x8ff   :  { %v1504_v4 = vadd.f32 %v4474_v3, %v5575_v0  ;;  %v1498_v5 = vpop.f32.mrb[17].mxu1 }
 0x900   :  { %v1499_v6 = vadd.f32 %v1498_v5, %v5577_v2 }
 0x901   :  { %v1510_v7 = vsel %vm335_vm1, %v1504_v4, -inf }
 0x902   :  { %1511 = vmax.xlane.f32.xlu1 %v1510_v7  ;;  %v1507_v8 = vsel %vm335_vm1, %v1499_v6, -inf }
 0x903   :  { %1508 = vmax.xlane.f32.xlu0 %v1507_v8  ;;  %v4964_v8 = vld [vmem:[#allocation11 + $0x30] sm:$0xff]  }
 0x904   :  { %4535 = vmatpush3.bf16.msra.mxu1 %v4964_v8  ;;  %v4989_v8 = vld [vmem:[#allocation8 + $0x138] sm:$0xff]  }
 0x905   :  { %4536 = vmatprep.subr.bf16.mxu1 %v5285_v1 }
 0x91e   :  { %v1628_v28 = vpop.f32.mrb[20].mxu1 }
 0x91f   :  { %v4493_v9 = vpop.f32.mrb[21].mxu1 }
 0x920   :  { %v1631_v10 = vpop.f32.mrb[22].mxu1 }
 0x921   :  { %v4826_v11 = vpack.c.bf16 %v1631_v10, %v1628_v28  ;;  %v4494_v12 = vpop.f32.mrb[23].mxu1  ;;  %v4965_v28 = vld [vmem:[#allocation11 + $0x38] sm:$0xff]  }
 0x922   :  { %4537 = vmatpush3.bf16.msra.mxu1 %v4965_v28 }
 0x923   :  { %4827 = vmatprep.subr.bf16.mxu0 %v4826_v11 }
 0x924   :  { %4829 = vmatpush3.bf16.msra.mxu0 %v4826_v11 }
 0x925   :  { %4502 = vmatprep.subr.bf16.mxu0 %v5285_v1 }
 0x98f   :  { %v1512_v16 = vpop.xlane.xlu1 %1511 }
 0x990   :  { %v1514_v17 = vsub.f32 %v1504_v4, %v1512_v16  ;;  %v1509_v18 = vpop.xlane.xlu0 %1508 }
 0x991   :  { %v1513_v19 = vsub.f32 %v1499_v6, %v1509_v18 }
 0x992   :  { %v1517_v20 = vmul.f32 1.442695, %v1514_v17 }
 0x993   :  { %v1515_v21 = vmul.f32 1.442695, %v1513_v19  ;;  %v4966_v19 = vld [vmem:[#allocation7 + $0x100] sm:$0xff]  }
 0x994   :  { %5074 = vpow2.f32 %v1517_v20  ;;  %v4967_v20 = vld [vmem:[#allocation7 + $0x108] sm:$0xff]  }
 0x995   :  { %5076 = vpow2.f32 %v1515_v21  ;;  %v4968_v21 = vld [vmem:[#allocation7 + $0x110] sm:$0xff]  }
 0x99e   :  { %v5075_v22 = vpop.eup %5074 }
 0x99f   :  { %v5077_v23 = vpop.eup %5076  ;;  %v1522_v24 = vsel %vm335_vm1, %v5075_v22, 0.0 }
 0x9a0   :  { %1523 = vadd.xlane.f32.xlu1 %v1522_v24  ;;  %v1519_v25 = vsel %vm335_vm1, %v5077_v23, 0.0 }
 0x9a1   :  { %1520 = vadd.xlane.f32.xlu0 %v1519_v25 }
 0xa2d   :  { %v1524_v26 = vpop.xlane.xlu1 %1523 }
 0xa2e   :  { %5078 = vrcp.f32 %v1524_v26  ;;  %v1521_v27 = vpop.xlane.xlu0 %1520 }
 0xa2f   :  { %5080 = vrcp.f32 %v1521_v27 }
 0xa38   :  { %v5079_v29 = vpop.eup %5078 }
 0xa39   :  { %v5081_v30 = vpop.eup %5080  ;;  %v1528_v32 = vmul.f32 %v5079_v29, %v5075_v22 }
 0xa3a   :  { %v1527_v31 = vmul.f32 %v5081_v30, %v5077_v23 }
 0xa3c   :  { %4499 = vmatprep.mubr.msk.f32.mxu0 %vm335_vm1, %v1527_v31  ;;  %v4969_v31 = vld [vmem:[#allocation7 + $0x118] sm:$0xff]  }
 0xa3d   :  { %4500 = vmatmul.mubr.msk.f32.vlgmr.msra.gmra.mrb[10].mxu0 %vm335_vm1, %v1528_v32  ;;  %v4970_v32 = vld [vmem:[#allocation7 + $0x120] sm:$0xff]  }
 0xa3e   :  { %4518 = vmatprep.mubr.msk.bf16.mxu0 %vm5286_vm0, %v5285_v1  ;;  %4503 = vmatpush3.bf16.msra.mxu0 %v4950_v33  ;;  %v4971_v33 = vld [vmem:[#allocation7 + $0x128] sm:$0xff]  }
 0xa3f   :  { %4504 = vmatprep.subr.bf16.mxu0 %v5285_v1 }
 0xa42   :  { %4505 = vmatpush3.bf16.msra.mxu0 %v4951_v34  ;;  %v4972_v34 = vld [vmem:[#allocation7 + $0x130] sm:$0xff]  }
 0xa43   :  { %4506 = vmatprep.subr.bf16.mxu0 %v5285_v1 }
 0xa46   :  { %4507 = vmatpush3.bf16.msra.mxu0 %v4952_v35  ;;  %v4973_v35 = vld [vmem:[#allocation7 + $0x138] sm:$0xff]  }
 0xa47   :  { %4508 = vmatprep.subr.bf16.mxu0 %v5285_v1 }
 0xa4a   :  { %4509 = vmatpush3.bf16.msra.mxu0 %v4953_v44 }
 0xa4b   :  { %4510 = vmatprep.subr.bf16.mxu0 %v5285_v1 }
 0xa4e   :  { %4511 = vmatpush3.bf16.msra.mxu0 %v4954_v45  ;;  %v3949_v45 = vld [vmem:[%s5811_s2 + $0x1] ss:$0 sm:$0xff] }
 0xa4f   :  { %4512 = vmatprep.subr.bf16.mxu0 %v5285_v1 }
 0xa52   :  { %4513 = vmatpush3.bf16.msra.mxu0 %v4955_v46 }
 0xa53   :  { %4514 = vmatprep.subr.bf16.mxu0 %v5285_v1 }
 0xa56   :  { %4515 = vmatpush3.bf16.msra.mxu0 %v4956_v47 }
 0xa57   :  { %4516 = vmatprep.subr.bf16.mxu0 %v5285_v1 }
 0xa5a   :  { %4517 = vmatpush3.bf16.msra.mxu0 %v4957_v48 }
 0xa5b   :  { %4542 = vmatprep.subr.bf16.mxu0 %v5285_v1 }
 0xb10   :  { %v4501_v36 = vpop.f32.mrb[10].mxu0 }
 0xb11   :  { %v5593_v38 = vadd.f32 %v5130_v37, %v4501_v36  ;;  %v1707_v39 = vpop.f32.mrb[11].mxu0 }
 0xb12   :  { %v5595_v41 = vadd.f32 %v5131_v40, %v1707_v39 }
 0xb13   :  { %v1722_v42 = vmul.f32 %v5593_v38, %v5593_v38 }
 0xb14   :  { %v1721_v43 = vmul.f32 %v5595_v41, %v5595_v41 }
 0xb15   :  { %1725 = vadd.xlane.f32.xlu1 %v1722_v42 }
 0xb16   :  { %1723 = vadd.xlane.f32.xlu0 %v1721_v43 }
 0xba2   :  { %v1726_v55 = vpop.xlane.xlu1 %1725 }
 0xba3   :  { %v1728_v56 = vmul.f32 0.03125, %v1726_v55  ;;  %v1724_v57 = vpop.xlane.xlu0 %1723  ;;  %v4979_v55 = vld [vmem:[#allocation7 + $0x168] sm:$0xff]  }
 0xba4   :  { %v1727_v58 = vmul.f32 0.03125, %v1724_v57  ;;  %v4981_v57 = vld [vmem:[#allocation7 + $0x178] sm:$0xff]  }
 0xba5   :  { %v1730_v59 = vadd.f32 1e-06, %v1728_v56  ;;  %v4980_v56 = vld [vmem:[#allocation7 + $0x170] sm:$0xff]  }
 0xba6   :  { %v1729_v60 = vadd.f32 1e-06, %v1727_v58 }
 0xba7   :  { %5082 = vrsqrt.f32 %v1730_v59  ;;  %v4982_v59 = vld [vmem:[#allocation8 + $0x100] sm:$0xff]  }
 0xba8   :  { %5084 = vrsqrt.f32 %v1729_v60 }
 0xbb1   :  { %v5083_v61 = vpop.eup %5082 }
 0xbb2   :  { %v5085_v63 = vpop.eup %5084  ;;  %v1734_v3 = vmul.f32 %v5083_v61, %v5593_v38 }
 0xbb3   :  { %v1733_v4 = vmul.f32 %v5085_v63, %v5595_v41  ;;  %v4983_v63 = vld [vmem:[#allocation8 + $0x108] sm:$0xff]  }
 0xbb4   :  { %v1740_v5 = vmul.f32 %v3932_v62, %v1734_v3  ;;  %v4984_v3 = vld [vmem:[#allocation8 + $0x110] sm:$0xff]  }
 0xbb5   :  { %v1739_v6 = vmul.f32 %v3932_v62, %v1733_v4  ;;  %v4985_v4 = vld [vmem:[#allocation8 + $0x118] sm:$0xff]  }
 0xbb7   :  { %v1741_v7 = vpack.c.bf16 %v1740_v5, %v1739_v6  ;;  %v4986_v5 = vld [vmem:[#allocation8 + $0x120] sm:$0xff]   ;;  %v4987_v6 = vld [vmem:[#allocation8 + $0x128] sm:$0xff]  }
 0xbb9   :  { %4519 = vmatmul.mubr.bf16.vlgmr.msra.gmra.mrb[20].mxu0 %v1741_v7  ;;  %v4988_v7 = vld [vmem:[#allocation8 + $0x130] sm:$0xff]  }
 0xbba   :  { %4558 = vmatprep.mubr.msk.bf16.mxu0 %vm5286_vm0, %v5285_v1  ;;  %4543 = vmatpush3.bf16.msra.mxu0 %v4966_v19  ;;  %v4994_v19 = vld [vmem:[#allocation8 + $0x160] sm:$0xff]  }
 0xbbb   :  { %4544 = vmatprep.subr.bf16.mxu0 %v5285_v1 }
 0xbbe   :  { %4545 = vmatpush3.bf16.msra.mxu0 %v4967_v20  ;;  %v4995_v20 = vld [vmem:[#allocation8 + $0x168] sm:$0xff]  }
 0xbbf   :  { %4546 = vmatprep.subr.bf16.mxu0 %v5285_v1 }
 0xbc2   :  { %4547 = vmatpush3.bf16.msra.mxu0 %v4968_v21  ;;  %v4996_v21 = vld [vmem:[#allocation8 + $0x170] sm:$0xff]  }
 0xbc3   :  { %4548 = vmatprep.subr.bf16.mxu0 %v5285_v1 }
 0xbc6   :  { %4549 = vmatpush3.bf16.msra.mxu0 %v4969_v31 }
 0xbc7   :  { %4550 = vmatprep.subr.bf16.mxu0 %v5285_v1 }
 0xbca   :  { %4551 = vmatpush3.bf16.msra.mxu0 %v4970_v32 }
 0xbcb   :  { %4552 = vmatprep.subr.bf16.mxu0 %v5285_v1 }
 0xbce   :  { %4553 = vmatpush3.bf16.msra.mxu0 %v4971_v33 }
 0xbcf   :  { %4554 = vmatprep.subr.bf16.mxu0 %v5285_v1 }
 0xbd2   :  { %4555 = vmatpush3.bf16.msra.mxu0 %v4972_v34  ;;  %v5132_v34 = vld [vmem:[#allocation5 + $0x18] sm:$0xff] }
 0xbd3   :  { %4556 = vmatprep.subr.bf16.mxu0 %v5285_v1 }
 0xbd6   :  { %4557 = vmatpush3.bf16.msra.mxu0 %v4973_v35 }
 0xbd7   :  { %4589 = vmatprep.subr.bf16.mxu0 %v5285_v1 }
 0xc8c   :  { %v1840_v9 = vpop.f32.mrb[20].mxu0 }
 0xc8d   :  { %v4520_v10 = vpop.f32.mrb[21].mxu0  ;;  %v1847_v12 = vmax.f32 %v1840_v9, 0.0 }
 0xc8e   :  { %v1843_v11 = vpop.f32.mrb[22].mxu0 }
 0xc8f   :  { %v1848_v16 = vmax.f32 %v1843_v11, 0.0  ;;  %v4521_v17 = vpop.f32.mrb[23].mxu0 }
 0xc90   :  { %v4992_v17 = vld [vmem:[#allocation8 + $0x150] sm:$0xff]  }
 0xc91   :  { %v1849_v18 = vpack.c.bf16 %v1848_v16, %v1847_v12  ;;  %v4990_v12 = vld [vmem:[#allocation8 + $0x140] sm:$0xff]   ;;  %v4991_v16 = vld [vmem:[#allocation8 + $0x148] sm:$0xff]  }
 0xc93   :  { %4539 = vmatmul.mubr.bf16.vlgmr.msra.gmra.mrb[24].mxu1 %v1849_v18  ;;  %v4993_v18 = vld [vmem:[#allocation8 + $0x158] sm:$0xff]  }
 0xd66   :  { %v1948_v22 = vpop.f32.mrb[24].mxu1 }
 0xd67   :  { %v5624_v23 = vadd.f32 %v1948_v22, %v5595_v41  ;;  %v4540_v24 = vpop.f32.mrb[25].mxu1  ;;  %v4997_v22 = vld [vmem:[#allocation8 + $0x178] sm:$0xff]  }
 0xd68   :  { %v1951_v25 = vpop.f32.mrb[26].mxu1 }
 0xd69   :  { %v5627_v26 = vadd.f32 %v1951_v25, %v5593_v38  ;;  %v4541_v27 = vpop.f32.mrb[27].mxu1  ;;  %v1958_v29 = vmul.f32 %v5624_v23, %v5624_v23 }
 0xd6b   :  { %1960 = vadd.xlane.f32.xlu0 %v1958_v29  ;;  %v1959_v30 = vmul.f32 %v5627_v26, %v5627_v26 }
 0xd6d   :  { %1962 = vadd.xlane.f32.xlu1 %v1959_v30 }
 0xdf8   :  { %v1961_v36 = vpop.xlane.xlu0 %1960 }
 0xdf9   :  { %v1964_v37 = vmul.f32 0.03125, %v1961_v36 }
 0xdfa   :  { %v1963_v38 = vpop.xlane.xlu1 %1962 }
 0xdfb   :  { %v1966_v39 = vadd.f32 1e-06, %v1964_v37  ;;  %v1965_v40 = vmul.f32 0.03125, %v1963_v38  ;;  %v5133_v37 = vld [vmem:[#allocation5 + $0x10] sm:$0xff] }
 0xdfd   :  { %5086 = vrsqrt.f32 %v1966_v39  ;;  %v1967_v41 = vadd.f32 1e-06, %v1965_v40 }
 0xdff   :  { %5088 = vrsqrt.f32 %v1967_v41  ;;  %v5134_v41 = vld [vmem:[#allocation5] sm:$0xff] }
 0xe07   :  { %v5087_v42 = vpop.eup %5086 }
 0xe08   :  { %v1970_v43 = vmul.f32 %v5087_v42, %v5624_v23 }
 0xe09   :  { %v5089_v44 = vpop.eup %5088 }
 0xe0a   :  { %v1971_v46 = vmul.f32 %v5089_v44, %v5627_v26  ;;  %v1976_v47 = vmul.f32 %v3949_v45, %v1970_v43 }
 0xe0c   :  { %v1977_v48 = vmul.f32 %v3949_v45, %v1971_v46 }
 0xe0e   :  { %v5643_v50 = vpack.c.bf16 %v1977_v48, %v1976_v47 }
 0xe10   :  { %4559 = vmatmul.mubr.bf16.vlgmr.msra.gmra.mrb[24].mxu0 %v5643_v50  ;;  %4831 = vmatprep.subr.bf16.mxu1 %v5643_v50 }
 0xe11   :  { %4590 = vmatpush3.bf16.msra.mxu0 %v4974_v49  ;;  %4833 = vmatpush3.bf16.xpose.msra.mxu1 %v5643_v50 }
 0xe12   :  { %4591 = vmatprep.subr.bf16.mxu0 %v5285_v1  ;;  %4605 = vmatprep.mubr.msk.bf16.mxu0 %vm5286_vm0, %v5285_v1 }
 0xe13   :  { %4569 = vmatprep.subr.bf16.mxu1 %v5285_v1 }
 0xe15   :  { %4592 = vmatpush3.bf16.msra.mxu0 %v4975_v51 }
 0xe16   :  { %4593 = vmatprep.subr.bf16.mxu0 %v5285_v1 }
 0xe19   :  { %4594 = vmatpush3.bf16.msra.mxu0 %v4976_v52 }
 0xe1a   :  { %4595 = vmatprep.subr.bf16.mxu0 %v5285_v1 }
 0xe1d   :  { %4596 = vmatpush3.bf16.msra.mxu0 %v4977_v53 }
 0xe1e   :  { %4597 = vmatprep.subr.bf16.mxu0 %v5285_v1 }
 0xe21   :  { %4598 = vmatpush3.bf16.msra.mxu0 %v4978_v54 }
 0xe22   :  { %4599 = vmatprep.subr.bf16.mxu0 %v5285_v1 }
 0xe25   :  { %4600 = vmatpush3.bf16.msra.mxu0 %v4979_v55 }
 0xe26   :  { %4601 = vmatprep.subr.bf16.mxu0 %v5285_v1 }
 0xe29   :  { %4602 = vmatpush3.bf16.msra.mxu0 %v4980_v56 }
 0xe2a   :  { %4603 = vmatprep.subr.bf16.mxu0 %v5285_v1 }
 0xe2d   :  { %4604 = vmatpush3.bf16.msra.mxu0 %v4981_v57 }
 0xe30   :  { %4606 = vmatmul.mubr.bf16.vlgmr.msra.gmra.mrb[28].mxu0 %v5643_v50 }
 0xee3   :  { %v2078_v58 = vpop.f32.mrb[24].mxu0 }
 0xee4   :  { %v4560_v60 = vpop.f32.mrb[25].mxu0  ;;  %4566 = vmatprep.mubr.f32.mxu1 %v2078_v58 }
 0xee5   :  { %v2081_v61 = vpop.f32.mrb[26].mxu0 }
 0xee6   :  { %v4561_v62 = vpop.f32.mrb[27].mxu0  ;;  %4567 = vmatmul.mubr.f32.vlgmr.msra.gmra.mrb[18].mxu1 %v2081_v61 }
 0xee7   :  { %4570 = vmatpush3.bf16.msra.mxu1 %v4982_v59  ;;  %4585 = vmatprep.mubr.msk.bf16.mxu1 %vm5286_vm0, %v5285_v1 }
 0xee8   :  { %4571 = vmatprep.subr.bf16.mxu1 %v5285_v1 }
 0xeeb   :  { %4572 = vmatpush3.bf16.msra.mxu1 %v4983_v63 }
 0xeec   :  { %4573 = vmatprep.subr.bf16.mxu1 %v5285_v1 }
 0xeef   :  { %4574 = vmatpush3.bf16.msra.mxu1 %v4984_v3 }
 0xef0   :  { %4575 = vmatprep.subr.bf16.mxu1 %v5285_v1 }
 0xef3   :  { %4576 = vmatpush3.bf16.msra.mxu1 %v4985_v4 }
 0xef4   :  { %4577 = vmatprep.subr.bf16.mxu1 %v5285_v1 }
 0xef7   :  { %4578 = vmatpush3.bf16.msra.mxu1 %v4986_v5 }
 0xef8   :  { %4579 = vmatprep.subr.bf16.mxu1 %v5285_v1 }
 0xefb   :  { %4580 = vmatpush3.bf16.msra.mxu1 %v4987_v6 }
 0xefc   :  { %4581 = vmatprep.subr.bf16.mxu1 %v5285_v1 }
 0xeff   :  { %4582 = vmatpush3.bf16.msra.mxu1 %v4988_v7 }
 0xf00   :  { %4583 = vmatprep.subr.bf16.mxu1 %v5285_v1 }
 0xf03   :  { %4584 = vmatpush3.bf16.msra.mxu1 %v4989_v8  ;;  %v2387_v28 = vpop.f32.mrb[28].mxu0 }
 0xf04   :  { %v4607_v9 = vpop.f32.mrb[29].mxu0  ;;  %4835 = vmatprep.subr.bf16.mxu1 %v5643_v50 }
 0xf05   :  { %v2390_v10 = vpop.f32.mrb[30].mxu0 }
 0xf06   :  { %4586 = vmatmul.mubr.bf16.vlgmr.msra.gmra.mrb[28].mxu1 %v5643_v50  ;;  %v4608_v11 = vpop.f32.mrb[31].mxu0 }
 0xf07   :  { %4613 = vmatprep.mubr.f32.mxu1 %v2387_v28 }
 0xf0c   :  { %4837 = vmatpush3.bf16.xpose.msra.mxu1 %v5643_v50 }
 0xf0d   :  { %4616 = vmatprep.subr.bf16.mxu1 %v5285_v1 }
 0xf13   :  { %4614 = vmatmul.mubr.f32.vlgmr.msra.gmra.mrb[32].mxu1 %v2390_v10 }
 0xf14   :  { %4617 = vmatpush3.bf16.msra.mxu1 %v4990_v12  ;;  %4632 = vmatprep.mubr.msk.bf16.mxu1 %vm5286_vm0, %v5285_v1 }
 0xf15   :  { %4618 = vmatprep.subr.bf16.mxu1 %v5285_v1 }
 0xf18   :  { %4619 = vmatpush3.bf16.msra.mxu1 %v4991_v16 }
 0xf19   :  { %4620 = vmatprep.subr.bf16.mxu1 %v5285_v1 }
 0xf1c   :  { %4621 = vmatpush3.bf16.msra.mxu1 %v4992_v17 }
 0xf1d   :  { %4622 = vmatprep.subr.bf16.mxu1 %v5285_v1 }
 0xf20   :  { %4623 = vmatpush3.bf16.msra.mxu1 %v4993_v18 }
 0xf21   :  { %4624 = vmatprep.subr.bf16.mxu1 %v5285_v1 }
 0xf24   :  { %4625 = vmatpush3.bf16.msra.mxu1 %v4994_v19 }
 0xf25   :  { %4626 = vmatprep.subr.bf16.mxu1 %v5285_v1 }
 0xf28   :  { %4627 = vmatpush3.bf16.msra.mxu1 %v4995_v20 }
 0xf29   :  { %4628 = vmatprep.subr.bf16.mxu1 %v5285_v1 }
 0xf2c   :  { %4629 = vmatpush3.bf16.msra.mxu1 %v4996_v21 }
 0xf2d   :  { %4630 = vmatprep.subr.bf16.mxu1 %v5285_v1 }
 0xf30   :  { %4631 = vmatpush3.bf16.msra.mxu1 %v4997_v22 }
 0xf31   :  { %4847 = vmatprep.subr.bf16.mxu1 %v5643_v50 }
 0xf33   :  { %4633 = vmatmul.mubr.bf16.vlgmr.msra.gmra.mrb[36].mxu1 %v5643_v50 }
 0xf39   :  { %4849 = vmatpush3.bf16.xpose.msra.mxu1 %v5643_v50 }
 0xf3a   :  { %4677 = vmatprep.subr.bf16.mxu1 %v5285_v1 }
 0xfb9   :  { %v4568_v24 = vpop.f32.mrb[18].mxu1 }
 0xfba   :  { %v2151_v25 = vpop.f32.mrb[19].mxu1  ;;  %v2157_v39 = vadd.f32 %v4568_v24, %v5500_v14  ;;  %v4998_v24 = vld [vmem:[#allocation7 + $0x180] sm:$0xff]  }
 0xfbb   :  { %v2152_v42 = vadd.f32 %v5134_v41, %v2151_v25  ;;  %v5008_v41 = vld [vmem:[#allocation8 + $0x190] sm:$0xff]  }
 0xfbc   :  { %v2163_v44 = vsel %vm335_vm1, %v2157_v39, -inf }
 0xfbd   :  { %v2160_v45 = vsel %vm335_vm1, %v2152_v42, -inf }
 0xfd9   :  { %v2281_v27 = vpop.f32.mrb[28].mxu1 }
 0xfda   :  { %v4587_v29 = vpop.f32.mrb[29].mxu1 }
 0xfdb   :  { %v2284_v30 = vpop.f32.mrb[30].mxu1  ;;  %v5000_v29 = vld [vmem:[#allocation7 + $0x190] sm:$0xff]  }
 0xfdc   :  { %v5685_v31 = vpack.c.bf16 %v2284_v30, %v2281_v27  ;;  %v4588_v32 = vpop.f32.mrb[31].mxu1  ;;  %v4999_v27 = vld [vmem:[#allocation7 + $0x188] sm:$0xff]   ;;  %v5001_v30 = vld [vmem:[#allocation7 + $0x198] sm:$0xff]  }
 0xfdd   :  { %v5003_v32 = vld [vmem:[#allocation7 + $0x1a8] sm:$0xff]  }
 0xfe6   :  { %v4615_v33 = vpop.f32.mrb[32].mxu1 }
 0xfe7   :  { %v2466_v35 = vadd.f32 %v5132_v34, %v4615_v33  ;;  %v2460_v36 = vpop.f32.mrb[33].mxu1  ;;  %v5004_v33 = vld [vmem:[#allocation7 + $0x1b0] sm:$0xff]   ;;  %v5005_v34 = vld [vmem:[#allocation7 + $0x1b8] sm:$0xff]  }
 0xfe8   :  { %v2461_v38 = vadd.f32 %v5133_v37, %v2460_v36  ;;  %v5006_v36 = vld [vmem:[#allocation8 + $0x180] sm:$0xff]  }
 0xfe9   :  { %v2472_v40 = vsel %vm335_vm1, %v2466_v35, -inf }
 0xfea   :  { %2473 = vmax.xlane.f32.xlu1 %v2472_v40  ;;  %v2469_v43 = vsel %vm335_vm1, %v2461_v38, -inf  ;;  %v5007_v40 = vld [vmem:[#allocation8 + $0x188] sm:$0xff]  }
 0xfeb   :  { %2470 = vmax.xlane.f32.xlu0 %v2469_v43  ;;  %v5010_v43 = vld [vmem:[#allocation8 + $0x1a0] sm:$0xff]  }
 0xfee   :  { %2164 = vmax.xlane.f32.xlu1 %v2163_v44  ;;  %v5011_v44 = vld [vmem:[#allocation8 + $0x1a8] sm:$0xff]  }
 0xfef   :  { %2161 = vmax.xlane.f32.xlu0 %v2160_v45  ;;  %v5012_v45 = vld [vmem:[#allocation8 + $0x1b0] sm:$0xff]  }
0x1006   :  { %v2590_v46 = vpop.f32.mrb[36].mxu1 }
0x1007   :  { %v4634_v47 = vpop.f32.mrb[37].mxu1 }
0x1008   :  { %v2593_v48 = vpop.f32.mrb[38].mxu1 }
0x1009   :  { %v4838_v49 = vpack.c.bf16 %v2593_v48, %v2590_v46  ;;  %v4635_v51 = vpop.f32.mrb[39].mxu1  ;;  %v5013_v46 = vld [vmem:[#allocation8 + $0x1b8] sm:$0xff]  }
0x100b   :  { %4839 = vmatprep.subr.bf16.mxu0 %v4838_v49 }
0x100c   :  { %4841 = vmatpush3.bf16.msra.mxu0 %v4838_v49 }
0x100d   :  { %4843 = vmatprep.subr.bf16.mxu0 %v5685_v31 }
0x1077   :  { %v2474_v14 = vpop.xlane.xlu1 %2473 }
0x1078   :  { %v2476_v52 = vsub.f32 %v2466_v35, %v2474_v14  ;;  %v2471_v53 = vpop.xlane.xlu0 %2470 }
0x1079   :  { %v2475_v54 = vsub.f32 %v2461_v38, %v2471_v53 }
0x107a   :  { %v2479_v55 = vmul.f32 1.442695, %v2476_v52 }
0x107b   :  { %v2477_v56 = vmul.f32 1.442695, %v2475_v54  ;;  %v2165_v57 = vpop.xlane.xlu1 %2164 }
0x107c   :  { %5090 = vpow2.f32 %v2479_v55  ;;  %v2167_v58 = vsub.f32 %v2157_v39, %v2165_v57  ;;  %v2162_v59 = vpop.xlane.xlu0 %2161 }
0x107d   :  { %5092 = vpow2.f32 %v2477_v56  ;;  %v2166_v60 = vsub.f32 %v2152_v42, %v2162_v59  ;;  %v5009_v42 = vld [vmem:[#allocation8 + $0x198] sm:$0xff]  }
0x107e   :  { %v2170_v61 = vmul.f32 1.442695, %v2167_v58 }
0x107f   :  { %v2168_v62 = vmul.f32 1.442695, %v2166_v60 }
0x1080   :  { %5094 = vpow2.f32 %v2170_v61 }
0x1081   :  { %5096 = vpow2.f32 %v2168_v62 }
0x1086   :  { %v5091_v63 = vpop.eup %5090 }
0x1087   :  { %v5093_v3 = vpop.eup %5092  ;;  %v2484_v4 = vsel %vm335_vm1, %v5091_v63, 0.0 }
0x1088   :  { %2485 = vadd.xlane.f32.xlu1 %v2484_v4  ;;  %v2481_v5 = vsel %vm335_vm1, %v5093_v3, 0.0 }
0x1089   :  { %2482 = vadd.xlane.f32.xlu0 %v2481_v5 }
0x108a   :  { %v5095_v6 = vpop.eup %5094 }
0x108b   :  { %v5097_v7 = vpop.eup %5096  ;;  %v2175_v8 = vsel %vm335_vm1, %v5095_v6, 0.0 }
0x108c   :  { %2176 = vadd.xlane.f32.xlu1 %v2175_v8  ;;  %v2172_v28 = vsel %vm335_vm1, %v5097_v7, 0.0 }
0x108d   :  { %2173 = vadd.xlane.f32.xlu0 %v2172_v28 }
0x1115   :  { %v2486_v9 = vpop.xlane.xlu1 %2485 }
0x1116   :  { %5098 = vrcp.f32 %v2486_v9  ;;  %v2483_v10 = vpop.xlane.xlu0 %2482  ;;  %v5014_v9 = vld [vmem:[#allocation7 + $0x1c0] sm:$0xff]  }
0x1117   :  { %5100 = vrcp.f32 %v2483_v10 }
0x1119   :  { %v2177_v12 = vpop.xlane.xlu1 %2176 }
0x111a   :  { %v2174_v11 = vpop.xlane.xlu0 %2173 }
0x111b   :  { %5102 = vrcp.f32 %v2174_v11  ;;  %v5015_v11 = vld [vmem:[#allocation7 + $0x1c8] sm:$0xff]  }
0x111c   :  { %5104 = vrcp.f32 %v2177_v12  ;;  %v5016_v12 = vld [vmem:[#allocation7 + $0x1d0] sm:$0xff]  }
0x1120   :  { %v5099_v16 = vpop.eup %5098 }
0x1121   :  { %v5101_v17 = vpop.eup %5100  ;;  %v2490_v19 = vmul.f32 %v5099_v16, %v5091_v63  ;;  %v5017_v16 = vld [vmem:[#allocation7 + $0x1d8] sm:$0xff]  }
0x1122   :  { %v2489_v18 = vmul.f32 %v5101_v17, %v5093_v3  ;;  %v5018_v17 = vld [vmem:[#allocation7 + $0x1e0] sm:$0xff]  }
0x1124   :  { %4640 = vmatprep.mubr.msk.f32.mxu0 %vm335_vm1, %v2489_v18  ;;  %v5019_v18 = vld [vmem:[#allocation7 + $0x1e8] sm:$0xff]  }
0x1125   :  { %v5103_v20 = vpop.eup %5102  ;;  %4641 = vmatmul.mubr.msk.f32.vlgmr.msra.gmra.mrb[32].mxu0 %vm335_vm1, %v2490_v19  ;;  %v5020_v19 = vld [vmem:[#allocation7 + $0x1f0] sm:$0xff]  }
0x1126   :  { %4845 = vmatpush3.bf16.msra.mxu0 %v5685_v31  ;;  %v2180_v21 = vmul.f32 %v5103_v20, %v5097_v7  ;;  %v5105_v22 = vpop.eup %5104  ;;  %v5002_v31 = vld [vmem:[#allocation7 + $0x1a0] sm:$0xff]   ;;  %v5021_v20 = vld [vmem:[#allocation7 + $0x1f8] sm:$0xff]  }
0x1127   :  { %4650 = vmatprep.subr.bf16.mxu0 %v5285_v1  ;;  %v2181_v25 = vmul.f32 %v5105_v22, %v5095_v6  ;;  %v5022_v22 = vld [vmem:[#allocation8 + $0x1c0] sm:$0xff]  }
0x1128   :  { %4647 = vmatprep.mubr.msk.f32.mxu0 %vm335_vm1, %v2180_v21 }
0x112d   :  { %4648 = vmatmul.mubr.msk.f32.vlgmr.msra.gmra.mrb[32].mxu0 %vm335_vm1, %v2181_v25 }
0x112e   :  { %4651 = vmatpush3.bf16.msra.mxu0 %v4998_v24  ;;  %4666 = vmatprep.mubr.msk.bf16.mxu0 %vm5286_vm0, %v5285_v1 }
0x112f   :  { %4652 = vmatprep.subr.bf16.mxu0 %v5285_v1 }
0x1132   :  { %4653 = vmatpush3.bf16.msra.mxu0 %v4999_v27 }
0x1133   :  { %4654 = vmatprep.subr.bf16.mxu0 %v5285_v1 }
0x1136   :  { %4655 = vmatpush3.bf16.msra.mxu0 %v5000_v29  ;;  %v5023_v29 = vld [vmem:[#allocation8 + $0x1c8] sm:$0xff]  }
0x1137   :  { %4656 = vmatprep.subr.bf16.mxu0 %v5285_v1 }
0x113a   :  { %4657 = vmatpush3.bf16.msra.mxu0 %v5001_v30  ;;  %v5024_v30 = vld [vmem:[#allocation8 + $0x1d0] sm:$0xff]  }
0x113b   :  { %4658 = vmatprep.subr.bf16.mxu0 %v5285_v1 }
0x113e   :  { %4659 = vmatpush3.bf16.msra.mxu0 %v5002_v31  ;;  %v5025_v31 = vld [vmem:[#allocation8 + $0x1d8] sm:$0xff]  }
0x113f   :  { %4660 = vmatprep.subr.bf16.mxu0 %v5285_v1 }
0x1142   :  { %4661 = vmatpush3.bf16.msra.mxu0 %v5003_v32  ;;  %v5026_v32 = vld [vmem:[#allocation8 + $0x1e0] sm:$0xff]  }
0x1143   :  { %4662 = vmatprep.subr.bf16.mxu0 %v5285_v1 }
0x1146   :  { %4663 = vmatpush3.bf16.msra.mxu0 %v5004_v33  ;;  %v5027_v33 = vld [vmem:[#allocation8 + $0x1e8] sm:$0xff]  }
0x1147   :  { %4664 = vmatprep.subr.bf16.mxu0 %v5285_v1 }
0x114a   :  { %4665 = vmatpush3.bf16.msra.mxu0 %v5005_v34  ;;  %v5028_v34 = vld [vmem:[#allocation8 + $0x1f0] sm:$0xff]  }
0x114d   :  { %4667 = vmatmul.mubr.bf16.vlgmr.msra.gmra.mrb[36].mxu0 %v5643_v50 }
0x1220   :  { %v2858_v35 = vpop.f32.mrb[36].mxu0 }
0x1221   :  { %v4668_v37 = vpop.f32.mrb[37].mxu0  ;;  %4674 = vmatprep.mubr.f32.mxu1 %v2858_v35  ;;  %v5029_v35 = vld [vmem:[#allocation8 + $0x1f8] sm:$0xff]  }
0x1222   :  { %v2861_v38 = vpop.f32.mrb[38].mxu0 }
0x1223   :  { %v4669_v39 = vpop.f32.mrb[39].mxu0  ;;  %4675 = vmatmul.mubr.f32.vlgmr.msra.gmra.mrb[34].mxu1 %v2861_v38 }
0x1224   :  { %4678 = vmatpush3.bf16.msra.mxu1 %v5006_v36  ;;  %4693 = vmatprep.mubr.msk.bf16.mxu1 %vm5286_vm0, %v5285_v1 }
0x1225   :  { %4679 = vmatprep.subr.bf16.mxu1 %v5285_v1 }
0x1228   :  { %4680 = vmatpush3.bf16.msra.mxu1 %v5007_v40 }
0x1229   :  { %4681 = vmatprep.subr.bf16.mxu1 %v5285_v1 }
0x122c   :  { %4682 = vmatpush3.bf16.msra.mxu1 %v5008_v41 }
0x122d   :  { %4683 = vmatprep.subr.bf16.mxu1 %v5285_v1 }
0x1230   :  { %4684 = vmatpush3.bf16.msra.mxu1 %v5009_v42 }
0x1231   :  { %4685 = vmatprep.subr.bf16.mxu1 %v5285_v1 }
0x1234   :  { %4686 = vmatpush3.bf16.msra.mxu1 %v5010_v43 }
0x1235   :  { %4687 = vmatprep.subr.bf16.mxu1 %v5285_v1 }
0x1238   :  { %4688 = vmatpush3.bf16.msra.mxu1 %v5011_v44 }
0x1239   :  { %4689 = vmatprep.subr.bf16.mxu1 %v5285_v1 }
0x123c   :  { %4690 = vmatpush3.bf16.msra.mxu1 %v5012_v45 }
0x123d   :  { %4691 = vmatprep.subr.bf16.mxu1 %v5285_v1 }
0x1240   :  { %4692 = vmatpush3.bf16.msra.mxu1 %v5013_v46 }
0x1241   :  { %4855 = vmatprep.subr.bf16.mxu1 %v5643_v50 }
0x1243   :  { %4694 = vmatmul.mubr.bf16.vlgmr.msra.gmra.mrb[40].mxu1 %v5643_v50 }
0x1249   :  { %4857 = vmatpush3.bf16.xpose.msra.mxu1 %v5643_v50 }
0x124a   :  { %4731 = vmatprep.subr.bf16.mxu1 %v5285_v1 }
0x12f6   :  { %v4676_v47 = vpop.f32.mrb[34].mxu1 }
0x12f7   :  { %v2937_v48 = vadd.f32 %v4676_v47, %v5539_v13  ;;  %v2931_v49 = vpop.f32.mrb[35].mxu1 }
0x12f8   :  { %v2932_v51 = vadd.f32 %v2931_v49, %v5541_v15 }
0x12f9   :  { %v2943_v14 = vsel %vm335_vm1, %v2937_v48, -inf }
0x12fa   :  { %2944 = vmax.xlane.f32.xlu1 %v2943_v14  ;;  %v2940_v52 = vsel %vm335_vm1, %v2932_v51, -inf }
0x12fb   :  { %2941 = vmax.xlane.f32.xlu0 %v2940_v52 }
0x1316   :  { %v3061_v53 = vpop.f32.mrb[40].mxu1 }
0x1317   :  { %v4695_v54 = vpop.f32.mrb[41].mxu1 }
0x1318   :  { %v3064_v55 = vpop.f32.mrb[42].mxu1 }
0x1319   :  { %v4850_v56 = vpack.c.bf16 %v3064_v55, %v3061_v53  ;;  %v4696_v57 = vpop.f32.mrb[43].mxu1 }
0x131b   :  { %4851 = vmatprep.subr.bf16.mxu0 %v4850_v56 }
0x131c   :  { %4853 = vmatpush3.bf16.msra.mxu0 %v4850_v56 }
0x131d   :  { %4704 = vmatprep.subr.bf16.mxu0 %v5285_v1 }
0x1387   :  { %v2945_v58 = vpop.xlane.xlu1 %2944 }
0x1388   :  { %v2947_v13 = vsub.f32 %v2937_v48, %v2945_v58  ;;  %v2942_v59 = vpop.xlane.xlu0 %2941 }
0x1389   :  { %v2946_v60 = vsub.f32 %v2932_v51, %v2942_v59  ;;  %v5030_v59 = vld [vmem:[#allocation10 + $0x40] sm:$0xff]  }
0x138a   :  { %v2950_v15 = vmul.f32 1.442695, %v2947_v13 }
0x138b   :  { %v2948_v61 = vmul.f32 1.442695, %v2946_v60  ;;  %v5031_v60 = vld [vmem:[#allocation10 + $0x48] sm:$0xff]  }
0x138c   :  { %5106 = vpow2.f32 %v2950_v15  ;;  %v5032_v15 = vld [vmem:[#allocation10 + $0x50] sm:$0xff]  }
0x138d   :  { %5108 = vpow2.f32 %v2948_v61 }
0x1396   :  { %v5107_v62 = vpop.eup %5106 }
0x1397   :  { %v5109_v63 = vpop.eup %5108  ;;  %v2955_v3 = vsel %vm335_vm1, %v5107_v62, 0.0 }
0x1398   :  { %2956 = vadd.xlane.f32.xlu1 %v2955_v3  ;;  %v2952_v4 = vsel %vm335_vm1, %v5109_v63, 0.0 }
0x1399   :  { %2953 = vadd.xlane.f32.xlu0 %v2952_v4 }
0x1425   :  { %v2957_v5 = vpop.xlane.xlu1 %2956 }
0x1426   :  { %5110 = vrcp.f32 %v2957_v5  ;;  %v2954_v6 = vpop.xlane.xlu0 %2953 }
0x1427   :  { %5112 = vrcp.f32 %v2954_v6  ;;  %v5033_v6 = vld [vmem:[#allocation10 + $0x58] sm:$0xff]  }
0x1430   :  { %v5111_v7 = vpop.eup %5110 }
0x1431   :  { %v5113_v8 = vpop.eup %5112  ;;  %v2961_v10 = vmul.f32 %v5111_v7, %v5107_v62  ;;  %v5034_v7 = vld [vmem:[#allocation10 + $0x60] sm:$0xff]  }
0x1432   :  { %v2960_v28 = vmul.f32 %v5113_v8, %v5109_v63  ;;  %v5037_v8 = vld [vmem:[#allocation10 + $0x78] sm:$0xff]  }
0x1434   :  { %4701 = vmatprep.mubr.msk.f32.mxu0 %vm335_vm1, %v2960_v28  ;;  %v5038_v28 = vld [vmem:[#allocation11 + $0x40] sm:$0xff]  }
0x1435   :  { %4702 = vmatmul.mubr.msk.f32.vlgmr.msra.gmra.mrb[32].mxu0 %vm335_vm1, %v2961_v10  ;;  %v5040_v10 = vld [vmem:[#allocation11 + $0x50] sm:$0xff]  }
0x1436   :  { %4705 = vmatpush3.bf16.msra.mxu0 %v5014_v9  ;;  %4720 = vmatprep.mubr.msk.bf16.mxu0 %vm5286_vm0, %v5285_v1  ;;  %v5039_v9 = vld [vmem:[#allocation11 + $0x48] sm:$0xff]  }
0x1437   :  { %4706 = vmatprep.subr.bf16.mxu0 %v5285_v1 }
0x143a   :  { %4707 = vmatpush3.bf16.msra.mxu0 %v5015_v11  ;;  %v5041_v11 = vld [vmem:[#allocation11 + $0x58] sm:$0xff]  }
0x143b   :  { %4708 = vmatprep.subr.bf16.mxu0 %v5285_v1 }
0x143e   :  { %4709 = vmatpush3.bf16.msra.mxu0 %v5016_v12  ;;  %v5042_v12 = vld [vmem:[#allocation11 + $0x60] sm:$0xff]  }
0x143f   :  { %4710 = vmatprep.subr.bf16.mxu0 %v5285_v1 }
0x1442   :  { %4711 = vmatpush3.bf16.msra.mxu0 %v5017_v16  ;;  %v5043_v16 = vld [vmem:[#allocation11 + $0x68] sm:$0xff]  }
0x1443   :  { %4712 = vmatprep.subr.bf16.mxu0 %v5285_v1 }
0x1446   :  { %4713 = vmatpush3.bf16.msra.mxu0 %v5018_v17 }
0x1447   :  { %4714 = vmatprep.subr.bf16.mxu0 %v5285_v1 }
0x144a   :  { %4715 = vmatpush3.bf16.msra.mxu0 %v5019_v18 }
0x144b   :  { %4716 = vmatprep.subr.bf16.mxu0 %v5285_v1 }
0x144e   :  { %4717 = vmatpush3.bf16.msra.mxu0 %v5020_v19 }
0x144f   :  { %4718 = vmatprep.subr.bf16.mxu0 %v5285_v1 }
0x1452   :  { %4719 = vmatpush3.bf16.msra.mxu0 %v5021_v20 }
0x1455   :  { %4721 = vmatmul.mubr.bf16.vlgmr.msra.gmra.mrb[40].mxu0 %v5643_v50 }
0x1528   :  { %v3250_v21 = vpop.f32.mrb[40].mxu0 }
0x1529   :  { %v4722_v24 = vpop.f32.mrb[41].mxu0  ;;  %4728 = vmatprep.mubr.f32.mxu1 %v3250_v21 }
0x152a   :  { %v3253_v25 = vpop.f32.mrb[42].mxu0 }
0x152b   :  { %v4723_v27 = vpop.f32.mrb[43].mxu0  ;;  %4729 = vmatmul.mubr.f32.vlgmr.msra.gmra.mrb[44].mxu1 %v3253_v25  ;;  %v4022_v25 = vld [vmem:[%s5814_s5 + $0x1] ss:$0 sm:$0xff] }
0x152c   :  { %4732 = vmatpush3.bf16.msra.mxu1 %v5022_v22  ;;  %4747 = vmatprep.mubr.msk.bf16.mxu1 %vm5286_vm0, %v5285_v1 }
0x152d   :  { %4733 = vmatprep.subr.bf16.mxu1 %v5285_v1 }
0x1530   :  { %4734 = vmatpush3.bf16.msra.mxu1 %v5023_v29 }
0x1531   :  { %4735 = vmatprep.subr.bf16.mxu1 %v5285_v1 }
0x1534   :  { %4736 = vmatpush3.bf16.msra.mxu1 %v5024_v30 }
0x1535   :  { %4737 = vmatprep.subr.bf16.mxu1 %v5285_v1 }
0x1538   :  { %4738 = vmatpush3.bf16.msra.mxu1 %v5025_v31 }
0x1539   :  { %4739 = vmatprep.subr.bf16.mxu1 %v5285_v1 }
0x153c   :  { %4740 = vmatpush3.bf16.msra.mxu1 %v5026_v32 }
0x153d   :  { %4741 = vmatprep.subr.bf16.mxu1 %v5285_v1 }
0x1540   :  { %4742 = vmatpush3.bf16.msra.mxu1 %v5027_v33 }
0x1541   :  { %4743 = vmatprep.subr.bf16.mxu1 %v5285_v1 }
0x1544   :  { %4744 = vmatpush3.bf16.msra.mxu1 %v5028_v34  ;;  %v5044_v34 = vld [vmem:[#allocation11 + $0x70] sm:$0xff]  }
0x1545   :  { %4745 = vmatprep.subr.bf16.mxu1 %v5285_v1 }
0x1548   :  { %4746 = vmatpush3.bf16.msra.mxu1 %v5029_v35  ;;  %v5045_v35 = vld [vmem:[#allocation11 + $0x78] sm:$0xff]  }
0x1549   :  { %4778 = vmatprep.subr.bf16.mxu1 %v5285_v1 }
0x154b   :  { %4748 = vmatmul.mubr.bf16.vlgmr.msra.gmra.mrb[48].mxu1 %v5643_v50 }
0x154c   :  { %4794 = vmatprep.mubr.msk.bf16.mxu1 %vm5286_vm0, %v5285_v1  ;;  %4779 = vmatpush3.bf16.msra.mxu1 %v5038_v28  ;;  %v4040_v28 = vld [vmem:[%s5818_s9] ss:$0 sm:$0xff] }
0x154d   :  { %4780 = vmatprep.subr.bf16.mxu1 %v5285_v1 }
0x1550   :  { %4781 = vmatpush3.bf16.msra.mxu1 %v5039_v9 }
0x1551   :  { %4782 = vmatprep.subr.bf16.mxu1 %v5285_v1 }
0x1554   :  { %4783 = vmatpush3.bf16.msra.mxu1 %v5040_v10 }
0x1555   :  { %4784 = vmatprep.subr.bf16.mxu1 %v5285_v1 }
0x1558   :  { %4785 = vmatpush3.bf16.msra.mxu1 %v5041_v11 }
0x1559   :  { %4786 = vmatprep.subr.bf16.mxu1 %v5285_v1 }
0x155c   :  { %4787 = vmatpush3.bf16.msra.mxu1 %v5042_v12 }
0x155d   :  { %4788 = vmatprep.subr.bf16.mxu1 %v5285_v1 }
0x1560   :  { %4789 = vmatpush3.bf16.msra.mxu1 %v5043_v16 }
0x1561   :  { %4790 = vmatprep.subr.bf16.mxu1 %v5285_v1 }
0x1564   :  { %4791 = vmatpush3.bf16.msra.mxu1 %v5044_v34 }
0x1565   :  { %4792 = vmatprep.subr.bf16.mxu1 %v5285_v1 }
0x1568   :  { %4793 = vmatpush3.bf16.msra.mxu1 %v5045_v35 }
0x15fe   :  { %v4730_v36 = vpop.f32.mrb[44].mxu1 }
0x15ff   :  { %v3329_v37 = vadd.f32 %v4730_v36, %v5575_v0  ;;  %v3323_v38 = vpop.f32.mrb[45].mxu1 }
0x1600   :  { %v3324_v39 = vadd.f32 %v3323_v38, %v5577_v2 }
0x1601   :  { %v3335_v40 = vsel %vm335_vm1, %v3329_v37, -inf }
0x1602   :  { %3336 = vmax.xlane.f32.xlu1 %v3335_v40  ;;  %v3332_v41 = vsel %vm335_vm1, %v3324_v39, -inf }
0x1603   :  { %3333 = vmax.xlane.f32.xlu0 %v3332_v41 }
0x161e   :  { %v3453_v42 = vpop.f32.mrb[48].mxu1 }
0x161f   :  { %v4749_v43 = vpop.f32.mrb[49].mxu1 }
0x1620   :  { %v3456_v44 = vpop.f32.mrb[50].mxu1 }
0x1621   :  { %v4858_v45 = vpack.c.bf16 %v3456_v44, %v3453_v42  ;;  %v4750_v50 = vpop.f32.mrb[51].mxu1 }
0x1623   :  { %4859 = vmatprep.subr.bf16.mxu0 %v4858_v45 }
0x1624   :  { %4861 = vmatpush3.bf16.msra.mxu0 %v4858_v45 }
0x1625   :  { %4758 = vmatprep.subr.bf16.mxu0 %v5285_v1 }
0x168f   :  { %v3337_v46 = vpop.xlane.xlu1 %3336 }
0x1690   :  { %v3339_v0 = vsub.f32 %v3329_v37, %v3337_v46  ;;  %v3334_v47 = vpop.xlane.xlu0 %3333 }
0x1691   :  { %v3338_v48 = vsub.f32 %v3324_v39, %v3334_v47 }
0x1692   :  { %v3342_v2 = vmul.f32 1.442695, %v3339_v0 }
0x1693   :  { %v3340_v49 = vmul.f32 1.442695, %v3338_v48 }
0x1694   :  { %5114 = vpow2.f32 %v3342_v2 }
0x1695   :  { %5116 = vpow2.f32 %v3340_v49 }
0x169e   :  { %v5115_v51 = vpop.eup %5114 }
0x169f   :  { %v5117_v14 = vpop.eup %5116  ;;  %v3347_v52 = vsel %vm335_vm1, %v5115_v51, 0.0 }
0x16a0   :  { %3348 = vadd.xlane.f32.xlu1 %v3347_v52  ;;  %v3344_v53 = vsel %vm335_vm1, %v5117_v14, 0.0 }
0x16a1   :  { %3345 = vadd.xlane.f32.xlu0 %v3344_v53 }
0x172d   :  { %v3349_v54 = vpop.xlane.xlu1 %3348 }
0x172e   :  { %5118 = vrcp.f32 %v3349_v54  ;;  %v3346_v55 = vpop.xlane.xlu0 %3345  ;;  %v4039_v54 = vld [vmem:[%s5817_s8] ss:$0 sm:$0xff] }
0x172f   :  { %5120 = vrcp.f32 %v3346_v55 }
0x1738   :  { %v5119_v56 = vpop.eup %5118 }
0x1739   :  { %v5121_v57 = vpop.eup %5120  ;;  %v3353_v13 = vmul.f32 %v5119_v56, %v5115_v51 }
0x173a   :  { %v3352_v58 = vmul.f32 %v5121_v57, %v5117_v14 }
0x173c   :  { %4755 = vmatprep.mubr.msk.f32.mxu0 %vm335_vm1, %v3352_v58 }
0x173d   :  { %4756 = vmatmul.mubr.msk.f32.vlgmr.msra.gmra.mrb[32].mxu0 %vm335_vm1, %v3353_v13 }
0x173e   :  { %4774 = vmatprep.mubr.msk.bf16.mxu0 %vm5286_vm0, %v5285_v1  ;;  %4759 = vmatpush3.bf16.msra.mxu0 %v5030_v59 }
0x173f   :  { %4760 = vmatprep.subr.bf16.mxu0 %v5285_v1 }
0x1742   :  { %4761 = vmatpush3.bf16.msra.mxu0 %v5031_v60 }
0x1743   :  { %4762 = vmatprep.subr.bf16.mxu0 %v5285_v1 }
0x1746   :  { %4763 = vmatpush3.bf16.msra.mxu0 %v5032_v15 }
0x1747   :  { %4764 = vmatprep.subr.bf16.mxu0 %v5285_v1 }
0x174a   :  { %4765 = vmatpush3.bf16.msra.mxu0 %v5033_v6 }
0x174b   :  { %4766 = vmatprep.subr.bf16.mxu0 %v5285_v1 }
0x174e   :  { %4767 = vmatpush3.bf16.msra.mxu0 %v5034_v7 }
0x174f   :  { %4768 = vmatprep.subr.bf16.mxu0 %v5285_v1 }
0x1810   :  { %v4757_v61 = vpop.f32.mrb[32].mxu0 }
0x1811   :  { %v5773_v62 = vadd.f32 %v4757_v61, %v5627_v26  ;;  %v3532_v63 = vpop.f32.mrb[33].mxu0  ;;  %v5035_v26 = vld [vmem:[#allocation10 + $0x68] sm:$0xff]  }
0x1812   :  { %v5776_v3 = vadd.f32 %v3532_v63, %v5624_v23  ;;  %4769 = vmatpush3.bf16.msra.mxu0 %v5035_v26  ;;  %v5036_v23 = vld [vmem:[#allocation10 + $0x70] sm:$0xff]  }
0x1813   :  { %v3547_v4 = vmul.f32 %v5773_v62, %v5773_v62  ;;  %4770 = vmatprep.subr.bf16.mxu0 %v5285_v1 }
0x1814   :  { %v3546_v5 = vmul.f32 %v5776_v3, %v5776_v3 }
0x1815   :  { %3550 = vadd.xlane.f32.xlu1 %v3547_v4 }
0x1816   :  { %3548 = vadd.xlane.f32.xlu0 %v3546_v5  ;;  %4771 = vmatpush3.bf16.msra.mxu0 %v5036_v23 }
0x1817   :  { %4772 = vmatprep.subr.bf16.mxu0 %v5285_v1 }
0x181a   :  { %4773 = vmatpush3.bf16.msra.mxu0 %v5037_v8 }
0x18a2   :  { %v3551_v17 = vpop.xlane.xlu1 %3550 }
0x18a3   :  { %v3553_v18 = vmul.f32 0.03125, %v3551_v17  ;;  %v3549_v19 = vpop.xlane.xlu0 %3548  ;;  %v4041_v17 = vld [vmem:[#allocation2] ss:$0 sm:$0xff] }
0x18a4   :  { %v3552_v20 = vmul.f32 0.03125, %v3549_v19 }
0x18a5   :  { %v3555_v21 = vadd.f32 1e-06, %v3553_v18 }
0x18a6   :  { %v3554_v22 = vadd.f32 1e-06, %v3552_v20 }
0x18a7   :  { %5122 = vrsqrt.f32 %v3555_v21 }
0x18a8   :  { %5124 = vrsqrt.f32 %v3554_v22 }
0x18b1   :  { %v5123_v24 = vpop.eup %5122 }
0x18b2   :  { %v5125_v27 = vpop.eup %5124  ;;  %v3559_v29 = vmul.f32 %v5123_v24, %v5773_v62 }
0x18b3   :  { %v3558_v30 = vmul.f32 %v5125_v27, %v5776_v3 }
0x18b4   :  { %v3565_v31 = vmul.f32 %v4022_v25, %v3559_v29 }
0x18b5   :  { %v3564_v32 = vmul.f32 %v4022_v25, %v3558_v30 }
0x18b7   :  { %v3566_v33 = vpack.c.bf16 %v3565_v31, %v3564_v32 }
0x18b9   :  { %4775 = vmatmul.mubr.bf16.vlgmr.msra.gmra.mrb[44].mxu0 %v3566_v33 }
0x198c   :  { %v3666_v36 = vpop.f32.mrb[44].mxu0 }
0x198d   :  { %v4776_v37 = vpop.f32.mrb[45].mxu0  ;;  %v3673_v39 = vmax.f32 %v3666_v36, 0.0 }
0x198e   :  { %v3669_v38 = vpop.f32.mrb[46].mxu0 }
0x198f   :  { %v3674_v40 = vmax.f32 %v3669_v38, 0.0  ;;  %v4777_v41 = vpop.f32.mrb[47].mxu0 }
0x1991   :  { %v3675_v42 = vpack.c.bf16 %v3674_v40, %v3673_v39 }
0x1993   :  { %4795 = vmatmul.mubr.bf16.vlgmr.msra.gmra.mrb[52].mxu1 %v3675_v42 }
0x1a66   :  { %v3775_v43 = vpop.f32.mrb[52].mxu1 }
0x1a67   :  { %v3782_v44 = vadd.f32 %v3775_v43, %v5776_v3  ;;  %v4796_v45 = vpop.f32.mrb[53].mxu1 }
0x1a68   :  { %v3778_v50 = vpop.f32.mrb[54].mxu1 }
0x1a69   :  { %v3783_v46 = vadd.f32 %v3778_v50, %v5773_v62  ;;  %v4797_v0 = vpop.f32.mrb[55].mxu1  ;;  %v3785_v47 = vmul.f32 %v3782_v44, %v3782_v44 }
0x1a6b   :  { %3787 = vadd.xlane.f32.xlu1 %v3785_v47  ;;  %v3786_v1 = vmul.f32 %v3783_v46, %v3783_v46 }
0x1a6d   :  { %3789 = vadd.xlane.f32.xlu0 %v3786_v1 }
0x1af8   :  { %v3788_v48 = vpop.xlane.xlu1 %3787 }
0x1af9   :  { %v3791_v2 = vmul.f32 0.03125, %v3788_v48 }
0x1afa   :  { %v3790_v49 = vpop.xlane.xlu0 %3789 }
0x1afb   :  { %v3793_v51 = vadd.f32 1e-06, %v3791_v2  ;;  %v3792_v14 = vmul.f32 0.03125, %v3790_v49 }
0x1afd   :  { %5126 = vrsqrt.f32 %v3793_v51  ;;  %v3794_v52 = vadd.f32 1e-06, %v3792_v14 }
0x1aff   :  { %5128 = vrsqrt.f32 %v3794_v52 }
0x1b07   :  { %v5127_v53 = vpop.eup %5126 }
0x1b08   :  { %v3797_v55 = vmul.f32 %v5127_v53, %v3782_v44 }
0x1b09   :  { %v5129_v56 = vpop.eup %5128 }
0x1b0a   :  { %v3805_v57 = vmul.f32 %v4039_v54, %v3797_v55  ;;  %v3798_v58 = vmul.f32 %v5129_v56, %v3783_v46 }
0x1b0c   :  { %v3806_v13 = vmul.f32 %v4039_v54, %v3798_v58  ;;  %v3807_v59 = vrot.slane %v3805_v57, 4 }
0x1b0e   :  { %v3808_v60 = vadd.f32 %v3807_v59, %v3805_v57  ;;  %v3813_v15 = vrot.slane %v3806_v13, 4 }
0x1b10   :  { %v3809_v61 = vrot.slane %v3808_v60, 2  ;;  %v3814_v62 = vadd.f32 %v3813_v15, %v3806_v13 }
0x1b12   :  { %v3810_v63 = vadd.f32 %v3809_v61, %v3808_v60  ;;  %v3815_v3 = vrot.slane %v3814_v62, 2 }
0x1b14   :  { %v3811_v4 = vrot.slane %v3810_v63, 1  ;;  %v3816_v5 = vadd.f32 %v3815_v3, %v3814_v62 }
0x1b16   :  { %v3812_v6 = vadd.f32 %v3811_v4, %v3810_v63  ;;  %v3817_v7 = vrot.slane %v3816_v5, 1 }
0x1b18   :  { %v3818_v26 = vadd.f32 %v3817_v7, %v3816_v5  ;;  %v3820_v23 = vmul.f32 0.125, %v3812_v6 }
0x1b1a   :  { %v3821_v8 = vmul.f32 0.125, %v3818_v26  ;;  %v3829_v10 = vmul.f32 %v4040_v28, %v3820_v23 }
0x1b1c   :  { %v3830_v9 = vmul.f32 %v4040_v28, %v3821_v8 }
0x1b1e   :  { %v3833_v11 = vrot.slane %v3830_v9, 7 }
0x1b20   :  { %v3835_v12 = vsel %vm3834_vm2, %v3833_v11, %v3829_v10 }
0x1b21   :  { %v3838_v16 = vsel %vm3837_vm3, %v3835_v12, 0.0 }
0x1b22   :  { %3839 = vadd.xlane.f32.xlu0 %v3838_v16 }
0x1baf   :  { %v3840_v18 = vpop.xlane.xlu0 %3839 }
0x1bb0   :  { %v3848_v19 = vadd.f32 %v4041_v17, %v3840_v18 }
0x1bb2   :  { %3850 = vst.msk [vmem:[%s5820_s11] sm:$0x3] %vm3849_vm4, %v3848_v19 }
0x1bb3   :  { %3855 = vsyncpa [#allocation4], 1 }
0x1bb4   :  { %3856 = vsyncpa [#allocation6], 1 }
0x1bb5   :  { %3857 = vsyncpa [#allocation9], 1 }
0x1bb6   :  { %3858 = vsyncpa [#allocation12], 1 }

</bundles_post_ra>
